<compile_context>
chip_gen: v6e
topology: v6e:2x2x1
jax: 0.10.0
libtpu: 0.0.40
codegen_flags: <defaults>
</compile_context>

<pallas_src>
import functools

import jax
import jax.numpy as jnp
from jax.experimental import pallas as pl
from jax.experimental.pallas import tpu as pltpu

NUM_HIDDEN = 32          # self.num_hidden
CHANNEL_DIM = 32         # channel_dim
SOS_ID = 1


def _decoder_kernel(feat_ref, tok_ref, gmat_ref,
                    w_init_ref, b_init_ref,
                    w_hh_ref, w12_ref, b12_ref,
                    out_ref, h_all_ref):
    NH = NUM_HIDDEN
    B, T, _ = h_all_ref.shape
    V = gmat_ref.shape[0]

    # ---- init_hidden: x = from_channel_emb(input_features); h0 = x[:, :NH], c0 = x[:, NH:]
    init = (jnp.dot(feat_ref[...], w_init_ref[...],
                    preferred_element_type=jnp.float32) + b_init_ref[...])
    h = init[:, :NH]
    c = init[:, NH:]

    # ---- hoisted, non-recurrent input path (all timesteps in one MXU matmul) ------------
    # one-hot built in-kernel from int32 tokens; gmat already folds emb @ W_ih + biases.
    iota_v = jax.lax.broadcasted_iota(jnp.int32, (T * B, V), 1)
    onehot = (iota_v == tok_ref[...]).astype(jnp.float32)              # (T*B, V)
    gx_all = jnp.dot(onehot, gmat_ref[...],
                     preferred_element_type=jnp.float32)               # (T*B, 4*NH)

    # ---- serial recurrence: only h @ W_hh + gate elementwise, fully unrolled -------------
    for t in range(T):
        gates = gx_all[t * B:(t + 1) * B, :] + jnp.dot(
            h, w_hh_ref[...], preferred_element_type=jnp.float32)      # (B, 4*NH)
        # PyTorch LSTMCell gate order: (i, f, g, o)
        i_g = jax.nn.sigmoid(gates[:, 0 * NH:1 * NH])
        f_g = jax.nn.sigmoid(gates[:, 1 * NH:2 * NH])
        g_g = jnp.tanh(gates[:, 2 * NH:3 * NH])
        o_g = jax.nn.sigmoid(gates[:, 3 * NH:4 * NH])
        c = f_g * c + i_g * g_g
        h = o_g * jnp.tanh(c)
        h_all_ref[:, t, :] = h        # stored B-major so the output needs no transpose

    # ---- deferred classifier + log_softmax, batched over all (b, t) ----------------------
    # TODO(synk): Dropout(0.5) omitted (identity in eval mode; no train-mode RNG here).
    h_flat = h_all_ref[...].reshape(B * T, NH)
    logits = (jnp.dot(h_flat, w12_ref[...],
                      preferred_element_type=jnp.float32) + b12_ref[...])   # (B*T, V)
    m = jnp.max(logits, axis=-1, keepdims=True)
    lse = m + jnp.log(jnp.sum(jnp.exp(logits - m), axis=-1, keepdims=True))
    out_ref[...] = (logits - lse).reshape(B, T, V)


def lstm_decoder_forward_ce(params, input_features, gt_captions):
    """Equivalent of LSTMDecoder.forward_ce (eval mode, ss_prob=0.0).

    input_features: (B, channel_dim) float32
    gt_captions   : (B, T) int32
    returns       : (B, T, vocab_size) float32 log-probs
    """
    # TODO(synk): scheduled-sampling branch (training, ss_prob > 0) not implemented.
    B, T = gt_captions.shape
    V = params["emb"].shape[0]
    NH = NUM_HIDDEN

    # Teacher forcing token at step t: SOS for t==0 else gt_captions[:, t-1].
    # Flattened T-major so step t is the contiguous row block [t*B, (t+1)*B).
    sos = jnp.full((B, 1), SOS_ID, dtype=jnp.int32)
    prev_tokens = jnp.concatenate([sos, gt_captions[:, :-1].astype(jnp.int32)], axis=1)
    tok_flat = jnp.transpose(prev_tokens).reshape(T * B, 1)            # (T*B, 1) int32

    # Algebraic fusions done once in the wrapper (all exact, see header):
    gmat = params["emb"] @ params["w_ih"] + params["b_ih"] + params["b_hh"]   # (V, 4*NH)
    w12 = params["w1"] @ params["w2"]                                         # (NH, V)
    b12 = params["b1"] @ params["w2"] + params["b2"]                          # (1, V)

    vmem = pl.BlockSpec(memory_space=pltpu.MemorySpace.VMEM)
    out = pl.pallas_call(
        _decoder_kernel,
        out_shape=jax.ShapeDtypeStruct((B, T, V), jnp.float32),
        in_specs=[vmem] * 8,
        out_specs=vmem,
        scratch_shapes=[
            pltpu.VMEM((B, T, NH), jnp.float32),   # deferred-classifier h buffer (B-major)
        ],
    )(input_features, tok_flat, gmat,
      params["w_init"], params["b_init"],
      params["w_hh"], w12, b12)
    # TODO(synk): for production B / v7x, add a batch-parallel grid (B multiples of 8)
    # and T-tiling of the output; omitted at this toy size (everything fits one VMEM tile).
    return out


def _reference_forward_ce(params, input_features, gt_captions):
    """Pure-JAX reference mirroring the PyTorch module (unfused), for validation."""
    B, T = gt_captions.shape
    NH = NUM_HIDDEN

    init = input_features @ params["w_init"] + params["b_init"]
    h, c = init[:, :NH], init[:, NH:]
    sos = jnp.full((B, 1), SOS_ID, dtype=gt_captions.dtype)
    prev_tokens = jnp.concatenate([sos, gt_captions[:, :-1]], axis=1)

    outs = []
    for t in range(T):
        x = params["emb"][prev_tokens[:, t]]
        gates = x @ params["w_ih"] + params["b_ih"] + h @ params["w_hh"] + params["b_hh"]
        i_g = jax.nn.sigmoid(gates[:, 0 * NH:1 * NH])
        f_g = jax.nn.sigmoid(gates[:, 1 * NH:2 * NH])
        g_g = jnp.tanh(gates[:, 2 * NH:3 * NH])
        o_g = jax.nn.sigmoid(gates[:, 3 * NH:4 * NH])
        c = f_g * c + i_g * g_g
        h = o_g * jnp.tanh(c)
        z1 = h @ params["w1"] + params["b1"]
        logits = z1 @ params["w2"] + params["b2"]
        outs.append(jax.nn.log_softmax(logits, axis=-1))
    return jnp.stack(outs, axis=1)


def make_params(key, vocab_size):
    """Deterministic synthetic parameters (PyTorch nn.Linear is y = x @ W.T + b;
    we store weights pre-transposed as (in, out))."""
    NH = NUM_HIDDEN
    ks = jax.random.split(key, 10)
    scale = 0.1
    return {
        "emb":    scale * jax.random.normal(ks[0], (vocab_size, NH), jnp.float32),
        "w_init": scale * jax.random.normal(ks[1], (CHANNEL_DIM, 2 * NH), jnp.float32),
        "b_init": scale * jax.random.normal(ks[2], (1, 2 * NH), jnp.float32),
        "w_ih":   scale * jax.random.normal(ks[3], (NH, 4 * NH), jnp.float32),
        "b_ih":   scale * jax.random.normal(ks[4], (1, 4 * NH), jnp.float32),
        "w_hh":   scale * jax.random.normal(ks[5], (NH, 4 * NH), jnp.float32),
        "b_hh":   scale * jax.random.normal(ks[6], (1, 4 * NH), jnp.float32),
        "w1":     scale * jax.random.normal(ks[7], (NH, NH), jnp.float32),
        "b1":     scale * jax.random.normal(ks[8], (1, NH), jnp.float32),
        "w2":     scale * jax.random.normal(ks[9], (NH, vocab_size), jnp.float32),
        "b2":     jnp.zeros((1, vocab_size), jnp.float32),
    }


if __name__ == "__main__":
    B, T, V = 8, 8, 128
    key = jax.random.PRNGKey(0)
    k_par, k_feat, k_tok = jax.random.split(key, 3)

    params = make_params(k_par, V)
    input_features = jax.random.normal(k_feat, (B, CHANNEL_DIM), jnp.float32)
    gt_captions = jax.random.randint(k_tok, (B, T), 0, V, dtype=jnp.int32)

    out = jax.jit(functools.partial(lstm_decoder_forward_ce, params))(
        input_features, gt_captions)
    out = jax.block_until_ready(out)

    ref = _reference_forward_ce(params, input_features, gt_captions)
    assert out.shape == (B, T, V)
    assert jnp.allclose(out, ref, atol=2e-3, rtol=2e-3)

    print("KERNEL_OK")
</pallas_src>

<mosaic_0001>
module attributes {stable_mosaic.version = 11 : i64} {
  func.func @_decoder_kernel(%arg0: memref<8x32xf32, #tpu.memory_space<vmem>>, %arg1: memref<64x1xi32, #tpu.memory_space<vmem>>, %arg2: memref<128x128xf32, #tpu.memory_space<vmem>>, %arg3: memref<32x64xf32, #tpu.memory_space<vmem>>, %arg4: memref<1x64xf32, #tpu.memory_space<vmem>>, %arg5: memref<32x128xf32, #tpu.memory_space<vmem>>, %arg6: memref<32x128xf32, #tpu.memory_space<vmem>>, %arg7: memref<1x128xf32, #tpu.memory_space<vmem>>, %arg8: memref<8x8x128xf32, #tpu.memory_space<vmem>>, %arg9: memref<8x8x32xf32, #tpu.memory_space<vmem>>) attributes {dimension_semantics = [], scalar_prefetch = 0 : i64, scratch_operands = 1 : i64, tpu.core_type = #tpu.core_type<tc>} {
    %c0 = arith.constant 0 : index
    %c0_0 = arith.constant 0 : index
    %0 = vector.load %arg0[%c0, %c0_0] : memref<8x32xf32, #tpu.memory_space<vmem>>, vector<8x32xf32>
    %c0_1 = arith.constant 0 : index
    %c0_2 = arith.constant 0 : index
    %1 = vector.load %arg3[%c0_1, %c0_2] : memref<32x64xf32, #tpu.memory_space<vmem>>, vector<32x64xf32>
    %cst = arith.constant dense<0.000000e+00> : vector<8x64xf32>
    %2 = tpu.matmul %0, %1, %cst {dimension_numbers = #tpu.dot_dimension_numbers<[1], [0], [0], [1], [0, 0, 1, 1], [], []>} : vector<8x32xf32>, vector<32x64xf32>, vector<8x64xf32> -> vector<8x64xf32>
    %c0_3 = arith.constant 0 : index
    %c0_4 = arith.constant 0 : index
    %3 = vector.load %arg4[%c0_3, %c0_4] : memref<1x64xf32, #tpu.memory_space<vmem>>, vector<1x64xf32>
    %4 = vector.broadcast %3 : vector<1x64xf32> to vector<8x64xf32>
    %5 = arith.addf %2, %4 : vector<8x64xf32>
    %6 = vector.extract_strided_slice %5 {offsets = [0, 0], sizes = [8, 32], strides = [1, 1]} : vector<8x64xf32> to vector<8x32xf32>
    %7 = vector.extract_strided_slice %5 {offsets = [0, 32], sizes = [8, 32], strides = [1, 1]} : vector<8x64xf32> to vector<8x32xf32>
    %8 = tpu.iota {dimensions = array<i32: 1>} : vector<64x128xi32>
    %c0_5 = arith.constant 0 : index
    %c0_6 = arith.constant 0 : index
    %9 = vector.load %arg1[%c0_5, %c0_6] : memref<64x1xi32, #tpu.memory_space<vmem>>, vector<64x1xi32>
    %10 = vector.broadcast %9 : vector<64x1xi32> to vector<64x128xi32>
    %11 = arith.cmpi eq, %8, %10 : vector<64x128xi32>
    %12 = arith.extui %11 : vector<64x128xi1> to vector<64x128xi32>
    %13 = arith.sitofp %12 : vector<64x128xi32> to vector<64x128xf32>
    %c0_7 = arith.constant 0 : index
    %c0_8 = arith.constant 0 : index
    %14 = vector.load %arg2[%c0_7, %c0_8] : memref<128x128xf32, #tpu.memory_space<vmem>>, vector<128x128xf32>
    %cst_9 = arith.constant dense<0.000000e+00> : vector<64x128xf32>
    %15 = tpu.matmul %13, %14, %cst_9 {dimension_numbers = #tpu.dot_dimension_numbers<[1], [0], [0], [1], [0, 0, 1, 1], [], []>} : vector<64x128xf32>, vector<128x128xf32>, vector<64x128xf32> -> vector<64x128xf32>
    %16 = vector.extract_strided_slice %15 {offsets = [0, 0], sizes = [8, 128], strides = [1, 1]} : vector<64x128xf32> to vector<8x128xf32>
    %c0_10 = arith.constant 0 : index
    %c0_11 = arith.constant 0 : index
    %17 = vector.load %arg5[%c0_10, %c0_11] : memref<32x128xf32, #tpu.memory_space<vmem>>, vector<32x128xf32>
    %cst_12 = arith.constant dense<0.000000e+00> : vector<8x128xf32>
    %18 = tpu.matmul %6, %17, %cst_12 {dimension_numbers = #tpu.dot_dimension_numbers<[1], [0], [0], [1], [0, 0, 1, 1], [], []>} : vector<8x32xf32>, vector<32x128xf32>, vector<8x128xf32> -> vector<8x128xf32>
    %19 = arith.addf %16, %18 : vector<8x128xf32>
    %20 = vector.extract_strided_slice %19 {offsets = [0, 0], sizes = [8, 32], strides = [1, 1]} : vector<8x128xf32> to vector<8x32xf32>
    %21 = arith.negf %20 : vector<8x32xf32>
    %22 = math.exp %21 : vector<8x32xf32>
    %cst_13 = arith.constant 1.000000e+00 : f32
    %23 = vector.broadcast %cst_13 : f32 to vector<8x32xf32>
    %24 = arith.addf %23, %22 : vector<8x32xf32>
    %25 = arith.divf %23, %24 : vector<8x32xf32>
    %26 = vector.extract_strided_slice %19 {offsets = [0, 32], sizes = [8, 32], strides = [1, 1]} : vector<8x128xf32> to vector<8x32xf32>
    %27 = arith.negf %26 : vector<8x32xf32>
    %28 = math.exp %27 : vector<8x32xf32>
    %cst_14 = arith.constant 1.000000e+00 : f32
    %29 = vector.broadcast %cst_14 : f32 to vector<8x32xf32>
    %30 = arith.addf %29, %28 : vector<8x32xf32>
    %31 = arith.divf %29, %30 : vector<8x32xf32>
    %32 = vector.extract_strided_slice %19 {offsets = [0, 64], sizes = [8, 32], strides = [1, 1]} : vector<8x128xf32> to vector<8x32xf32>
    %33 = math.tanh %32 : vector<8x32xf32>
    %34 = vector.extract_strided_slice %19 {offsets = [0, 96], sizes = [8, 32], strides = [1, 1]} : vector<8x128xf32> to vector<8x32xf32>
    %35 = arith.negf %34 : vector<8x32xf32>
    %36 = math.exp %35 : vector<8x32xf32>
    %cst_15 = arith.constant 1.000000e+00 : f32
    %37 = vector.broadcast %cst_15 : f32 to vector<8x32xf32>
    %38 = arith.addf %37, %36 : vector<8x32xf32>
    %39 = arith.divf %37, %38 : vector<8x32xf32>
    %40 = arith.mulf %31, %7 : vector<8x32xf32>
    %41 = arith.mulf %25, %33 : vector<8x32xf32>
    %42 = arith.addf %40, %41 : vector<8x32xf32>
    %43 = math.tanh %42 : vector<8x32xf32>
    %44 = arith.mulf %39, %43 : vector<8x32xf32>
    %c0_16 = arith.constant 0 : index
    %c0_17 = arith.constant 0 : index
    %c0_18 = arith.constant 0 : index
    %45 = vector.load %arg9[%c0_16, %c0_17, %c0_18] : memref<8x8x32xf32, #tpu.memory_space<vmem>>, vector<8x1x32xf32>
    %46 = vector.shape_cast %45 : vector<8x1x32xf32> to vector<8x32xf32>
    %47 = vector.shape_cast %44 : vector<8x32xf32> to vector<8x1x32xf32>
    tpu.vector_store %arg9[%c0_16, %c0_17, %c0_18], %47 {strides = array<i32>} : memref<8x8x32xf32, #tpu.memory_space<vmem>>, vector<8x1x32xf32>,
    %48 = vector.extract_strided_slice %15 {offsets = [8, 0], sizes = [8, 128], strides = [1, 1]} : vector<64x128xf32> to vector<8x128xf32>
    %c0_19 = arith.constant 0 : index
    %c0_20 = arith.constant 0 : index
    %49 = vector.load %arg5[%c0_19, %c0_20] : memref<32x128xf32, #tpu.memory_space<vmem>>, vector<32x128xf32>
    %cst_21 = arith.constant dense<0.000000e+00> : vector<8x128xf32>
    %50 = tpu.matmul %44, %49, %cst_21 {dimension_numbers = #tpu.dot_dimension_numbers<[1], [0], [0], [1], [0, 0, 1, 1], [], []>} : vector<8x32xf32>, vector<32x128xf32>, vector<8x128xf32> -> vector<8x128xf32>
    %51 = arith.addf %48, %50 : vector<8x128xf32>
    %52 = vector.extract_strided_slice %51 {offsets = [0, 0], sizes = [8, 32], strides = [1, 1]} : vector<8x128xf32> to vector<8x32xf32>
    %53 = arith.negf %52 : vector<8x32xf32>
    %54 = math.exp %53 : vector<8x32xf32>
    %cst_22 = arith.constant 1.000000e+00 : f32
    %55 = vector.broadcast %cst_22 : f32 to vector<8x32xf32>
    %56 = arith.addf %55, %54 : vector<8x32xf32>
    %57 = arith.divf %55, %56 : vector<8x32xf32>
    %58 = vector.extract_strided_slice %51 {offsets = [0, 32], sizes = [8, 32], strides = [1, 1]} : vector<8x128xf32> to vector<8x32xf32>
    %59 = arith.negf %58 : vector<8x32xf32>
    %60 = math.exp %59 : vector<8x32xf32>
    %cst_23 = arith.constant 1.000000e+00 : f32
    %61 = vector.broadcast %cst_23 : f32 to vector<8x32xf32>
    %62 = arith.addf %61, %60 : vector<8x32xf32>
    %63 = arith.divf %61, %62 : vector<8x32xf32>
    %64 = vector.extract_strided_slice %51 {offsets = [0, 64], sizes = [8, 32], strides = [1, 1]} : vector<8x128xf32> to vector<8x32xf32>
    %65 = math.tanh %64 : vector<8x32xf32>
    %66 = vector.extract_strided_slice %51 {offsets = [0, 96], sizes = [8, 32], strides = [1, 1]} : vector<8x128xf32> to vector<8x32xf32>
    %67 = arith.negf %66 : vector<8x32xf32>
    %68 = math.exp %67 : vector<8x32xf32>
    %cst_24 = arith.constant 1.000000e+00 : f32
    %69 = vector.broadcast %cst_24 : f32 to vector<8x32xf32>
    %70 = arith.addf %69, %68 : vector<8x32xf32>
    %71 = arith.divf %69, %70 : vector<8x32xf32>
    %72 = arith.mulf %63, %42 : vector<8x32xf32>
    %73 = arith.mulf %57, %65 : vector<8x32xf32>
    %74 = arith.addf %72, %73 : vector<8x32xf32>
    %75 = math.tanh %74 : vector<8x32xf32>
    %76 = arith.mulf %71, %75 : vector<8x32xf32>
    %c0_25 = arith.constant 0 : index
    %c1 = arith.constant 1 : index
    %c0_26 = arith.constant 0 : index
    %77 = vector.load %arg9[%c0_25, %c1, %c0_26] : memref<8x8x32xf32, #tpu.memory_space<vmem>>, vector<8x1x32xf32>
    %78 = vector.shape_cast %77 : vector<8x1x32xf32> to vector<8x32xf32>
    %79 = vector.shape_cast %76 : vector<8x32xf32> to vector<8x1x32xf32>
    tpu.vector_store %arg9[%c0_25, %c1, %c0_26], %79 {strides = array<i32>} : memref<8x8x32xf32, #tpu.memory_space<vmem>>, vector<8x1x32xf32>,
    %80 = vector.extract_strided_slice %15 {offsets = [16, 0], sizes = [8, 128], strides = [1, 1]} : vector<64x128xf32> to vector<8x128xf32>
    %c0_27 = arith.constant 0 : index
    %c0_28 = arith.constant 0 : index
    %81 = vector.load %arg5[%c0_27, %c0_28] : memref<32x128xf32, #tpu.memory_space<vmem>>, vector<32x128xf32>
    %cst_29 = arith.constant dense<0.000000e+00> : vector<8x128xf32>
    %82 = tpu.matmul %76, %81, %cst_29 {dimension_numbers = #tpu.dot_dimension_numbers<[1], [0], [0], [1], [0, 0, 1, 1], [], []>} : vector<8x32xf32>, vector<32x128xf32>, vector<8x128xf32> -> vector<8x128xf32>
    %83 = arith.addf %80, %82 : vector<8x128xf32>
    %84 = vector.extract_strided_slice %83 {offsets = [0, 0], sizes = [8, 32], strides = [1, 1]} : vector<8x128xf32> to vector<8x32xf32>
    %85 = arith.negf %84 : vector<8x32xf32>
    %86 = math.exp %85 : vector<8x32xf32>
    %cst_30 = arith.constant 1.000000e+00 : f32
    %87 = vector.broadcast %cst_30 : f32 to vector<8x32xf32>
    %88 = arith.addf %87, %86 : vector<8x32xf32>
    %89 = arith.divf %87, %88 : vector<8x32xf32>
    %90 = vector.extract_strided_slice %83 {offsets = [0, 32], sizes = [8, 32], strides = [1, 1]} : vector<8x128xf32> to vector<8x32xf32>
    %91 = arith.negf %90 : vector<8x32xf32>
    %92 = math.exp %91 : vector<8x32xf32>
    %cst_31 = arith.constant 1.000000e+00 : f32
    %93 = vector.broadcast %cst_31 : f32 to vector<8x32xf32>
    %94 = arith.addf %93, %92 : vector<8x32xf32>
    %95 = arith.divf %93, %94 : vector<8x32xf32>
    %96 = vector.extract_strided_slice %83 {offsets = [0, 64], sizes = [8, 32], strides = [1, 1]} : vector<8x128xf32> to vector<8x32xf32>
    %97 = math.tanh %96 : vector<8x32xf32>
    %98 = vector.extract_strided_slice %83 {offsets = [0, 96], sizes = [8, 32], strides = [1, 1]} : vector<8x128xf32> to vector<8x32xf32>
    %99 = arith.negf %98 : vector<8x32xf32>
    %100 = math.exp %99 : vector<8x32xf32>
    %cst_32 = arith.constant 1.000000e+00 : f32
    %101 = vector.broadcast %cst_32 : f32 to vector<8x32xf32>
    %102 = arith.addf %101, %100 : vector<8x32xf32>
    %103 = arith.divf %101, %102 : vector<8x32xf32>
    %104 = arith.mulf %95, %74 : vector<8x32xf32>
    %105 = arith.mulf %89, %97 : vector<8x32xf32>
    %106 = arith.addf %104, %105 : vector<8x32xf32>
    %107 = math.tanh %106 : vector<8x32xf32>
    %108 = arith.mulf %103, %107 : vector<8x32xf32>
    %c0_33 = arith.constant 0 : index
    %c2 = arith.constant 2 : index
    %c0_34 = arith.constant 0 : index
    %109 = vector.load %arg9[%c0_33, %c2, %c0_34] : memref<8x8x32xf32, #tpu.memory_space<vmem>>, vector<8x1x32xf32>
    %110 = vector.shape_cast %109 : vector<8x1x32xf32> to vector<8x32xf32>
    %111 = vector.shape_cast %108 : vector<8x32xf32> to vector<8x1x32xf32>
    tpu.vector_store %arg9[%c0_33, %c2, %c0_34], %111 {strides = array<i32>} : memref<8x8x32xf32, #tpu.memory_space<vmem>>, vector<8x1x32xf32>,
    %112 = vector.extract_strided_slice %15 {offsets = [24, 0], sizes = [8, 128], strides = [1, 1]} : vector<64x128xf32> to vector<8x128xf32>
    %c0_35 = arith.constant 0 : index
    %c0_36 = arith.constant 0 : index
    %113 = vector.load %arg5[%c0_35, %c0_36] : memref<32x128xf32, #tpu.memory_space<vmem>>, vector<32x128xf32>
    %cst_37 = arith.constant dense<0.000000e+00> : vector<8x128xf32>
    %114 = tpu.matmul %108, %113, %cst_37 {dimension_numbers = #tpu.dot_dimension_numbers<[1], [0], [0], [1], [0, 0, 1, 1], [], []>} : vector<8x32xf32>, vector<32x128xf32>, vector<8x128xf32> -> vector<8x128xf32>
    %115 = arith.addf %112, %114 : vector<8x128xf32>
    %116 = vector.extract_strided_slice %115 {offsets = [0, 0], sizes = [8, 32], strides = [1, 1]} : vector<8x128xf32> to vector<8x32xf32>
    %117 = arith.negf %116 : vector<8x32xf32>
    %118 = math.exp %117 : vector<8x32xf32>
    %cst_38 = arith.constant 1.000000e+00 : f32
    %119 = vector.broadcast %cst_38 : f32 to vector<8x32xf32>
    %120 = arith.addf %119, %118 : vector<8x32xf32>
    %121 = arith.divf %119, %120 : vector<8x32xf32>
    %122 = vector.extract_strided_slice %115 {offsets = [0, 32], sizes = [8, 32], strides = [1, 1]} : vector<8x128xf32> to vector<8x32xf32>
    %123 = arith.negf %122 : vector<8x32xf32>
    %124 = math.exp %123 : vector<8x32xf32>
    %cst_39 = arith.constant 1.000000e+00 : f32
    %125 = vector.broadcast %cst_39 : f32 to vector<8x32xf32>
    %126 = arith.addf %125, %124 : vector<8x32xf32>
    %127 = arith.divf %125, %126 : vector<8x32xf32>
    %128 = vector.extract_strided_slice %115 {offsets = [0, 64], sizes = [8, 32], strides = [1, 1]} : vector<8x128xf32> to vector<8x32xf32>
    %129 = math.tanh %128 : vector<8x32xf32>
    %130 = vector.extract_strided_slice %115 {offsets = [0, 96], sizes = [8, 32], strides = [1, 1]} : vector<8x128xf32> to vector<8x32xf32>
    %131 = arith.negf %130 : vector<8x32xf32>
    %132 = math.exp %131 : vector<8x32xf32>
    %cst_40 = arith.constant 1.000000e+00 : f32
    %133 = vector.broadcast %cst_40 : f32 to vector<8x32xf32>
    %134 = arith.addf %133, %132 : vector<8x32xf32>
    %135 = arith.divf %133, %134 : vector<8x32xf32>
    %136 = arith.mulf %127, %106 : vector<8x32xf32>
    %137 = arith.mulf %121, %129 : vector<8x32xf32>
    %138 = arith.addf %136, %137 : vector<8x32xf32>
    %139 = math.tanh %138 : vector<8x32xf32>
    %140 = arith.mulf %135, %139 : vector<8x32xf32>
    %c0_41 = arith.constant 0 : index
    %c3 = arith.constant 3 : index
    %c0_42 = arith.constant 0 : index
    %141 = vector.load %arg9[%c0_41, %c3, %c0_42] : memref<8x8x32xf32, #tpu.memory_space<vmem>>, vector<8x1x32xf32>
    %142 = vector.shape_cast %141 : vector<8x1x32xf32> to vector<8x32xf32>
    %143 = vector.shape_cast %140 : vector<8x32xf32> to vector<8x1x32xf32>
    tpu.vector_store %arg9[%c0_41, %c3, %c0_42], %143 {strides = array<i32>} : memref<8x8x32xf32, #tpu.memory_space<vmem>>, vector<8x1x32xf32>,
    %144 = vector.extract_strided_slice %15 {offsets = [32, 0], sizes = [8, 128], strides = [1, 1]} : vector<64x128xf32> to vector<8x128xf32>
    %c0_43 = arith.constant 0 : index
    %c0_44 = arith.constant 0 : index
    %145 = vector.load %arg5[%c0_43, %c0_44] : memref<32x128xf32, #tpu.memory_space<vmem>>, vector<32x128xf32>
    %cst_45 = arith.constant dense<0.000000e+00> : vector<8x128xf32>
    %146 = tpu.matmul %140, %145, %cst_45 {dimension_numbers = #tpu.dot_dimension_numbers<[1], [0], [0], [1], [0, 0, 1, 1], [], []>} : vector<8x32xf32>, vector<32x128xf32>, vector<8x128xf32> -> vector<8x128xf32>
    %147 = arith.addf %144, %146 : vector<8x128xf32>
    %148 = vector.extract_strided_slice %147 {offsets = [0, 0], sizes = [8, 32], strides = [1, 1]} : vector<8x128xf32> to vector<8x32xf32>
    %149 = arith.negf %148 : vector<8x32xf32>
    %150 = math.exp %149 : vector<8x32xf32>
    %cst_46 = arith.constant 1.000000e+00 : f32
    %151 = vector.broadcast %cst_46 : f32 to vector<8x32xf32>
    %152 = arith.addf %151, %150 : vector<8x32xf32>
    %153 = arith.divf %151, %152 : vector<8x32xf32>
    %154 = vector.extract_strided_slice %147 {offsets = [0, 32], sizes = [8, 32], strides = [1, 1]} : vector<8x128xf32> to vector<8x32xf32>
    %155 = arith.negf %154 : vector<8x32xf32>
    %156 = math.exp %155 : vector<8x32xf32>
    %cst_47 = arith.constant 1.000000e+00 : f32
    %157 = vector.broadcast %cst_47 : f32 to vector<8x32xf32>
    %158 = arith.addf %157, %156 : vector<8x32xf32>
    %159 = arith.divf %157, %158 : vector<8x32xf32>
    %160 = vector.extract_strided_slice %147 {offsets = [0, 64], sizes = [8, 32], strides = [1, 1]} : vector<8x128xf32> to vector<8x32xf32>
    %161 = math.tanh %160 : vector<8x32xf32>
    %162 = vector.extract_strided_slice %147 {offsets = [0, 96], sizes = [8, 32], strides = [1, 1]} : vector<8x128xf32> to vector<8x32xf32>
    %163 = arith.negf %162 : vector<8x32xf32>
    %164 = math.exp %163 : vector<8x32xf32>
    %cst_48 = arith.constant 1.000000e+00 : f32
    %165 = vector.broadcast %cst_48 : f32 to vector<8x32xf32>
    %166 = arith.addf %165, %164 : vector<8x32xf32>
    %167 = arith.divf %165, %166 : vector<8x32xf32>
    %168 = arith.mulf %159, %138 : vector<8x32xf32>
    %169 = arith.mulf %153, %161 : vector<8x32xf32>
    %170 = arith.addf %168, %169 : vector<8x32xf32>
    %171 = math.tanh %170 : vector<8x32xf32>
    %172 = arith.mulf %167, %171 : vector<8x32xf32>
    %c0_49 = arith.constant 0 : index
    %c4 = arith.constant 4 : index
    %c0_50 = arith.constant 0 : index
    %173 = vector.load %arg9[%c0_49, %c4, %c0_50] : memref<8x8x32xf32, #tpu.memory_space<vmem>>, vector<8x1x32xf32>
    %174 = vector.shape_cast %173 : vector<8x1x32xf32> to vector<8x32xf32>
    %175 = vector.shape_cast %172 : vector<8x32xf32> to vector<8x1x32xf32>
    tpu.vector_store %arg9[%c0_49, %c4, %c0_50], %175 {strides = array<i32>} : memref<8x8x32xf32, #tpu.memory_space<vmem>>, vector<8x1x32xf32>,
    %176 = vector.extract_strided_slice %15 {offsets = [40, 0], sizes = [8, 128], strides = [1, 1]} : vector<64x128xf32> to vector<8x128xf32>
    %c0_51 = arith.constant 0 : index
    %c0_52 = arith.constant 0 : index
    %177 = vector.load %arg5[%c0_51, %c0_52] : memref<32x128xf32, #tpu.memory_space<vmem>>, vector<32x128xf32>
    %cst_53 = arith.constant dense<0.000000e+00> : vector<8x128xf32>
    %178 = tpu.matmul %172, %177, %cst_53 {dimension_numbers = #tpu.dot_dimension_numbers<[1], [0], [0], [1], [0, 0, 1, 1], [], []>} : vector<8x32xf32>, vector<32x128xf32>, vector<8x128xf32> -> vector<8x128xf32>
    %179 = arith.addf %176, %178 : vector<8x128xf32>
    %180 = vector.extract_strided_slice %179 {offsets = [0, 0], sizes = [8, 32], strides = [1, 1]} : vector<8x128xf32> to vector<8x32xf32>
    %181 = arith.negf %180 : vector<8x32xf32>
    %182 = math.exp %181 : vector<8x32xf32>
    %cst_54 = arith.constant 1.000000e+00 : f32
    %183 = vector.broadcast %cst_54 : f32 to vector<8x32xf32>
    %184 = arith.addf %183, %182 : vector<8x32xf32>
    %185 = arith.divf %183, %184 : vector<8x32xf32>
    %186 = vector.extract_strided_slice %179 {offsets = [0, 32], sizes = [8, 32], strides = [1, 1]} : vector<8x128xf32> to vector<8x32xf32>
    %187 = arith.negf %186 : vector<8x32xf32>
    %188 = math.exp %187 : vector<8x32xf32>
    %cst_55 = arith.constant 1.000000e+00 : f32
    %189 = vector.broadcast %cst_55 : f32 to vector<8x32xf32>
    %190 = arith.addf %189, %188 : vector<8x32xf32>
    %191 = arith.divf %189, %190 : vector<8x32xf32>
    %192 = vector.extract_strided_slice %179 {offsets = [0, 64], sizes = [8, 32], strides = [1, 1]} : vector<8x128xf32> to vector<8x32xf32>
    %193 = math.tanh %192 : vector<8x32xf32>
    %194 = vector.extract_strided_slice %179 {offsets = [0, 96], sizes = [8, 32], strides = [1, 1]} : vector<8x128xf32> to vector<8x32xf32>
    %195 = arith.negf %194 : vector<8x32xf32>
    %196 = math.exp %195 : vector<8x32xf32>
    %cst_56 = arith.constant 1.000000e+00 : f32
    %197 = vector.broadcast %cst_56 : f32 to vector<8x32xf32>
    %198 = arith.addf %197, %196 : vector<8x32xf32>
    %199 = arith.divf %197, %198 : vector<8x32xf32>
    %200 = arith.mulf %191, %170 : vector<8x32xf32>
    %201 = arith.mulf %185, %193 : vector<8x32xf32>
    %202 = arith.addf %200, %201 : vector<8x32xf32>
    %203 = math.tanh %202 : vector<8x32xf32>
    %204 = arith.mulf %199, %203 : vector<8x32xf32>
    %c0_57 = arith.constant 0 : index
    %c5 = arith.constant 5 : index
    %c0_58 = arith.constant 0 : index
    %205 = vector.load %arg9[%c0_57, %c5, %c0_58] : memref<8x8x32xf32, #tpu.memory_space<vmem>>, vector<8x1x32xf32>
    %206 = vector.shape_cast %205 : vector<8x1x32xf32> to vector<8x32xf32>
    %207 = vector.shape_cast %204 : vector<8x32xf32> to vector<8x1x32xf32>
    tpu.vector_store %arg9[%c0_57, %c5, %c0_58], %207 {strides = array<i32>} : memref<8x8x32xf32, #tpu.memory_space<vmem>>, vector<8x1x32xf32>,
    %208 = vector.extract_strided_slice %15 {offsets = [48, 0], sizes = [8, 128], strides = [1, 1]} : vector<64x128xf32> to vector<8x128xf32>
    %c0_59 = arith.constant 0 : index
    %c0_60 = arith.constant 0 : index
    %209 = vector.load %arg5[%c0_59, %c0_60] : memref<32x128xf32, #tpu.memory_space<vmem>>, vector<32x128xf32>
    %cst_61 = arith.constant dense<0.000000e+00> : vector<8x128xf32>
    %210 = tpu.matmul %204, %209, %cst_61 {dimension_numbers = #tpu.dot_dimension_numbers<[1], [0], [0], [1], [0, 0, 1, 1], [], []>} : vector<8x32xf32>, vector<32x128xf32>, vector<8x128xf32> -> vector<8x128xf32>
    %211 = arith.addf %208, %210 : vector<8x128xf32>
    %212 = vector.extract_strided_slice %211 {offsets = [0, 0], sizes = [8, 32], strides = [1, 1]} : vector<8x128xf32> to vector<8x32xf32>
    %213 = arith.negf %212 : vector<8x32xf32>
    %214 = math.exp %213 : vector<8x32xf32>
    %cst_62 = arith.constant 1.000000e+00 : f32
    %215 = vector.broadcast %cst_62 : f32 to vector<8x32xf32>
    %216 = arith.addf %215, %214 : vector<8x32xf32>
    %217 = arith.divf %215, %216 : vector<8x32xf32>
    %218 = vector.extract_strided_slice %211 {offsets = [0, 32], sizes = [8, 32], strides = [1, 1]} : vector<8x128xf32> to vector<8x32xf32>
    %219 = arith.negf %218 : vector<8x32xf32>
    %220 = math.exp %219 : vector<8x32xf32>
    %cst_63 = arith.constant 1.000000e+00 : f32
    %221 = vector.broadcast %cst_63 : f32 to vector<8x32xf32>
    %222 = arith.addf %221, %220 : vector<8x32xf32>
    %223 = arith.divf %221, %222 : vector<8x32xf32>
    %224 = vector.extract_strided_slice %211 {offsets = [0, 64], sizes = [8, 32], strides = [1, 1]} : vector<8x128xf32> to vector<8x32xf32>
    %225 = math.tanh %224 : vector<8x32xf32>
    %226 = vector.extract_strided_slice %211 {offsets = [0, 96], sizes = [8, 32], strides = [1, 1]} : vector<8x128xf32> to vector<8x32xf32>
    %227 = arith.negf %226 : vector<8x32xf32>
    %228 = math.exp %227 : vector<8x32xf32>
    %cst_64 = arith.constant 1.000000e+00 : f32
    %229 = vector.broadcast %cst_64 : f32 to vector<8x32xf32>
    %230 = arith.addf %229, %228 : vector<8x32xf32>
    %231 = arith.divf %229, %230 : vector<8x32xf32>
    %232 = arith.mulf %223, %202 : vector<8x32xf32>
    %233 = arith.mulf %217, %225 : vector<8x32xf32>
    %234 = arith.addf %232, %233 : vector<8x32xf32>
    %235 = math.tanh %234 : vector<8x32xf32>
    %236 = arith.mulf %231, %235 : vector<8x32xf32>
    %c0_65 = arith.constant 0 : index
    %c6 = arith.constant 6 : index
    %c0_66 = arith.constant 0 : index
    %237 = vector.load %arg9[%c0_65, %c6, %c0_66] : memref<8x8x32xf32, #tpu.memory_space<vmem>>, vector<8x1x32xf32>
    %238 = vector.shape_cast %237 : vector<8x1x32xf32> to vector<8x32xf32>
    %239 = vector.shape_cast %236 : vector<8x32xf32> to vector<8x1x32xf32>
    tpu.vector_store %arg9[%c0_65, %c6, %c0_66], %239 {strides = array<i32>} : memref<8x8x32xf32, #tpu.memory_space<vmem>>, vector<8x1x32xf32>,
    %240 = vector.extract_strided_slice %15 {offsets = [56, 0], sizes = [8, 128], strides = [1, 1]} : vector<64x128xf32> to vector<8x128xf32>
    %c0_67 = arith.constant 0 : index
    %c0_68 = arith.constant 0 : index
    %241 = vector.load %arg5[%c0_67, %c0_68] : memref<32x128xf32, #tpu.memory_space<vmem>>, vector<32x128xf32>
    %cst_69 = arith.constant dense<0.000000e+00> : vector<8x128xf32>
    %242 = tpu.matmul %236, %241, %cst_69 {dimension_numbers = #tpu.dot_dimension_numbers<[1], [0], [0], [1], [0, 0, 1, 1], [], []>} : vector<8x32xf32>, vector<32x128xf32>, vector<8x128xf32> -> vector<8x128xf32>
    %243 = arith.addf %240, %242 : vector<8x128xf32>
    %244 = vector.extract_strided_slice %243 {offsets = [0, 0], sizes = [8, 32], strides = [1, 1]} : vector<8x128xf32> to vector<8x32xf32>
    %245 = arith.negf %244 : vector<8x32xf32>
    %246 = math.exp %245 : vector<8x32xf32>
    %cst_70 = arith.constant 1.000000e+00 : f32
    %247 = vector.broadcast %cst_70 : f32 to vector<8x32xf32>
    %248 = arith.addf %247, %246 : vector<8x32xf32>
    %249 = arith.divf %247, %248 : vector<8x32xf32>
    %250 = vector.extract_strided_slice %243 {offsets = [0, 32], sizes = [8, 32], strides = [1, 1]} : vector<8x128xf32> to vector<8x32xf32>
    %251 = arith.negf %250 : vector<8x32xf32>
    %252 = math.exp %251 : vector<8x32xf32>
    %cst_71 = arith.constant 1.000000e+00 : f32
    %253 = vector.broadcast %cst_71 : f32 to vector<8x32xf32>
    %254 = arith.addf %253, %252 : vector<8x32xf32>
    %255 = arith.divf %253, %254 : vector<8x32xf32>
    %256 = vector.extract_strided_slice %243 {offsets = [0, 64], sizes = [8, 32], strides = [1, 1]} : vector<8x128xf32> to vector<8x32xf32>
    %257 = math.tanh %256 : vector<8x32xf32>
    %258 = vector.extract_strided_slice %243 {offsets = [0, 96], sizes = [8, 32], strides = [1, 1]} : vector<8x128xf32> to vector<8x32xf32>
    %259 = arith.negf %258 : vector<8x32xf32>
    %260 = math.exp %259 : vector<8x32xf32>
    %cst_72 = arith.constant 1.000000e+00 : f32
    %261 = vector.broadcast %cst_72 : f32 to vector<8x32xf32>
    %262 = arith.addf %261, %260 : vector<8x32xf32>
    %263 = arith.divf %261, %262 : vector<8x32xf32>
    %264 = arith.mulf %255, %234 : vector<8x32xf32>
    %265 = arith.mulf %249, %257 : vector<8x32xf32>
    %266 = arith.addf %264, %265 : vector<8x32xf32>
    %267 = math.tanh %266 : vector<8x32xf32>
    %268 = arith.mulf %263, %267 : vector<8x32xf32>
    %c0_73 = arith.constant 0 : index
    %c7 = arith.constant 7 : index
    %c0_74 = arith.constant 0 : index
    %269 = vector.load %arg9[%c0_73, %c7, %c0_74] : memref<8x8x32xf32, #tpu.memory_space<vmem>>, vector<8x1x32xf32>
    %270 = vector.shape_cast %269 : vector<8x1x32xf32> to vector<8x32xf32>
    %271 = vector.shape_cast %268 : vector<8x32xf32> to vector<8x1x32xf32>
    tpu.vector_store %arg9[%c0_73, %c7, %c0_74], %271 {strides = array<i32>} : memref<8x8x32xf32, #tpu.memory_space<vmem>>, vector<8x1x32xf32>,
    %c0_75 = arith.constant 0 : index
    %c0_76 = arith.constant 0 : index
    %c0_77 = arith.constant 0 : index
    %272 = vector.load %arg9[%c0_75, %c0_76, %c0_77] : memref<8x8x32xf32, #tpu.memory_space<vmem>>, vector<8x8x32xf32>
    %273 = vector.shape_cast %272 : vector<8x8x32xf32> to vector<64x32xf32>
    %c0_78 = arith.constant 0 : index
    %c0_79 = arith.constant 0 : index
    %274 = vector.load %arg6[%c0_78, %c0_79] : memref<32x128xf32, #tpu.memory_space<vmem>>, vector<32x128xf32>
    %cst_80 = arith.constant dense<0.000000e+00> : vector<64x128xf32>
    %275 = tpu.matmul %273, %274, %cst_80 {dimension_numbers = #tpu.dot_dimension_numbers<[1], [0], [0], [1], [0, 0, 1, 1], [], []>} : vector<64x32xf32>, vector<32x128xf32>, vector<64x128xf32> -> vector<64x128xf32>
    %c0_81 = arith.constant 0 : index
    %c0_82 = arith.constant 0 : index
    %276 = vector.load %arg7[%c0_81, %c0_82] : memref<1x128xf32, #tpu.memory_space<vmem>>, vector<1x128xf32>
    %277 = vector.broadcast %276 : vector<1x128xf32> to vector<64x128xf32>
    %278 = arith.addf %275, %277 : vector<64x128xf32>
    %cst_83 = arith.constant dense<0xFF800000> : vector<64xf32>
    %279 = vector.multi_reduction <maximumf>, %278, %cst_83 [1] : vector<64x128xf32> to vector<64xf32>
    %280 = vector.shape_cast %279 : vector<64xf32> to vector<64x1xf32>
    %281 = vector.broadcast %280 : vector<64x1xf32> to vector<64x128xf32>
    %282 = arith.subf %278, %281 : vector<64x128xf32>
    %283 = math.exp %282 : vector<64x128xf32>
    %cst_84 = arith.constant dense<0.000000e+00> : vector<64xf32>
    %284 = vector.multi_reduction <add>, %283, %cst_84 [1] : vector<64x128xf32> to vector<64xf32>
    %285 = vector.shape_cast %284 : vector<64xf32> to vector<64x1xf32>
    %286 = math.log %285 : vector<64x1xf32>
    %287 = arith.addf %280, %286 : vector<64x1xf32>
    %288 = vector.broadcast %287 : vector<64x1xf32> to vector<64x128xf32>
    %289 = arith.subf %278, %288 : vector<64x128xf32>
    %290 = vector.shape_cast %289 : vector<64x128xf32> to vector<8x8x128xf32>
    %c0_85 = arith.constant 0 : index
    %c0_86 = arith.constant 0 : index
    %c0_87 = arith.constant 0 : index
    %291 = vector.load %arg8[%c0_85, %c0_86, %c0_87] : memref<8x8x128xf32, #tpu.memory_space<vmem>>, vector<8x8x128xf32>
    tpu.vector_store %arg8[%c0_85, %c0_86, %c0_87], %290 {strides = array<i32>} : memref<8x8x128xf32, #tpu.memory_space<vmem>>, vector<8x8x128xf32>,
    return
  }
}

</mosaic_0001>

<bundles_post_ra>
// kernel: lstm_decoder_forward_ce.1
= control target key start
LH: loop header
LB: loop body
LE: loop exit
PB: predicated region body
PF: predicated region fallthrough
CT: control target
= control target key end

     0   :  { %13 = vsyncpa [#allocation4], 0  ;;  %s3408_s0 = inlined_call_operand.vmem [shape: f32[8,32], index: 0, kind: input, shape index: {}]   ;;  %s3409_s1 = inlined_call_operand.vmem [shape: s32[64,1], index: 1, kind: input, shape index: {}]   ;;  %s3410_s2 = inlined_call_operand.hbm [shape: f32[128,128], index: 2, kind: input, shape index: {}]   ;;  %s3411_s3 = inlined_call_operand.vmem [shape: f32[32,64], index: 3, kind: input, shape index: {}]   ;;  %s3412_s4 = inlined_call_operand.vmem [shape: f32[1,64], index: 4, kind: input, shape index: {}]   ;;  %s3413_s5 = inlined_call_operand.vmem [shape: f32[32,128], index: 5, kind: input, shape index: {}]   ;;  %s3414_s6 = inlined_call_operand.vmem [shape: f32[32,128], index: 6, kind: input, shape index: {}]   ;;  %s3415_s7 = inlined_call_operand.vmem [shape: f32[1,128], index: 7, kind: input, shape index: {}]   ;;  %s3416_s8 = inlined_call_operand.hbm [shape: f32[8,8,128], index: 8, kind: output, shape index: {}]  }
   0x1   :  { %14 = vsyncpa [#allocation5], 0  ;;  %s2746_s27 = smov [#allocation3]  }
   0x2   :  { %s24_s28 = sshll.u32 %s2746_s27, 4  ;;  %s25_s28 = int_to_ptr.vmem [resolvable:$true] %s24_s28 }
   0x3   :  { %s2710_s29 = scalar_lea.vmem %s25_s28, 2048  ;;  %p2715_p1 = scmp.lt.s32.totalorder %s25_s28, %s25_s28 }
   0x4   :  { %p2711_p0 = scmp.ne.s32.totalorder %s25_s28, %s2710_s29  ;;  %p2716_p2 = scmp.lt.s32.totalorder %s2710_s29, %s2710_s29 }
   0x6   :  { %p2717_p3 = por %p2716_p2, %p2715_p1 }
   0x8   :  { %p2718_p4 = pnand %p2717_p3, %p2711_p0 }
   0xa   :  { %2721 = shalt.err (!%p2718_p4)
}
   0xb   :  { %s2747_s30 = smov 128   ;;  %s2748_s9 = smov 8  }
   0xc   :  { %30 = dma.hbm_to_vmem [thread:$0]  %s3410_s2, 2048, %s25_s28, [#allocation4], %s2747_s30, %s2747_s30, %s2748_s9  }
   0xd   :  { %2742 = dma.done.wait [#allocation4], 2048  }
   0xe   :  { %2743 = vsyncadd [#allocation4], 4294965248  ;;  %v2749_v0 = vmov 0.0   ;;  %vm2750_vm0 = vmmov 0   ;;  %v2751_v1 = vmov 0   ;;  %v48_v2 = vld [vmem:[%s3411_s3 + $0x18] sm:$0xff]  ;;  %v130_v29 = vlaneseq }
   0xf   :  { %2430 = vmatprep.subr.mxu1 %v2749_v0  ;;  %2438 = vmatprep.mubr.msk.f32.mxu1 %vm2750_vm0, %v2749_v0  ;;  %v47_v3 = vld [vmem:[%s3411_s3 + $0x10] sm:$0xff]  ;;  %v132_v4 = vld [vmem:[%s3409_s1] sm:$0xff]  ;;  %v46_v5 = vld [vmem:[%s3411_s3 + $0x8] sm:$0xff]  ;;  %vm56_vm1 = vcmask 261120   ;;  %v2752_v32 = vmov 1.0   ;;  %s2754_s12 = smov 32  }
  0x10   :  { %2604 = vset.pattern.permute.xlu0 %v2751_v1  ;;  %2485 = vmatprep.subr.mxu0 %v2749_v0  ;;  %v133_v6 = vld [vmem:[%s3409_s1 + $0x8] sm:$0xff]  ;;  %v45_v7 = vld [vmem:[%s3411_s3] sm:$0xff]  ;;  %v203_v9 = vld [vmem:[#allocation3 + $0x78] sm:$0xff]  ;;  %v2869_v30 = vand.u32 127, %v130_v29  ;;  %vm517_vm10 = vcmask 253952  }
  0x11   :  { %2493 = vmatprep.mubr.msk.f32.mxu0 %vm2750_vm0, %v2749_v0  ;;  %2605 = vset.pattern.permute.xlu1 %v2751_v1  ;;  %v44_v8 = vld [vmem:[%s3408_s0] sm:$0xff]  ;;  %v202_v10 = vld [vmem:[#allocation3 + $0x70] sm:$0xff]  ;;  %v2841_v11 = vld [vmem:[%s3413_s5 + $0x18] sm:$0xff] }
  0x12   :  { %2431 = vmatpush3.msra.mxu1 %v48_v2  ;;  %141 = vperm.xlu0 %2604, %v132_v4   ;;  %v2847_v12 = vld [vmem:[%s3413_s5 + $0x10] sm:$0xff]  ;;  %v201_v13 = vld [vmem:[#allocation3 + $0x68] sm:$0xff]  ;;  %v200_v14 = vld [vmem:[#allocation3 + $0x60] sm:$0xff] }
  0x13   :  { %2432 = vmatprep.subr.mxu1 %v2749_v0  ;;  %2486 = vmatpush3.msra.mxu0 %v2841_v11  ;;  %v199_v15 = vld [vmem:[#allocation3 + $0x58] sm:$0xff]  ;;  %v198_v16 = vld [vmem:[#allocation3 + $0x50] sm:$0xff]  ;;  %v197_v17 = vld [vmem:[#allocation3 + $0x48] sm:$0xff] }
  0x14   :  { %2433 = vmatpush3.msra.mxu1 %v47_v3  ;;  %2487 = vmatprep.subr.mxu0 %v2749_v0  ;;  %v196_v18 = vld [vmem:[#allocation3 + $0x40] sm:$0xff]  ;;  %v195_v19 = vld [vmem:[#allocation3 + $0x38] sm:$0xff]  ;;  %v194_v20 = vld [vmem:[#allocation3 + $0x30] sm:$0xff] }
  0x15   :  { %2434 = vmatprep.subr.mxu1 %v2749_v0  ;;  %2488 = vmatpush3.msra.mxu0 %v2847_v12  ;;  %v193_v21 = vld [vmem:[#allocation3 + $0x28] sm:$0xff]  ;;  %v192_v22 = vld [vmem:[#allocation3 + $0x20] sm:$0xff]  ;;  %v191_v23 = vld [vmem:[#allocation3 + $0x18] sm:$0xff] }
  0x16   :  { %2435 = vmatpush3.msra.mxu1 %v46_v5  ;;  %144 = vperm.xlu0 %2604, %v133_v6   ;;  %v190_v24 = vld [vmem:[#allocation3 + $0x10] sm:$0xff]  ;;  %v189_v25 = vld [vmem:[#allocation3 + $0x8] sm:$0xff]  ;;  %v188_v26 = vld [vmem:[#allocation3] sm:$0xff] }
  0x17   :  { %2436 = vmatprep.subr.mxu1 %v2749_v0  ;;  %2489 = vmatprep.subr.mxu0 %v2749_v0  ;;  %v2857_v27 = vld [vmem:[%s3413_s5 + $0x8] sm:$0xff]  ;;  %v2864_v28 = vld [vmem:[%s3413_s5] sm:$0xff]  ;;  %v134_v4 = vld [vmem:[%s3409_s1 + $0x10] sm:$0xff] }
  0x18   :  { %2437 = vmatpush3.msra.mxu1 %v45_v7  ;;  %2490 = vmatpush3.msra.mxu0 %v2857_v27  ;;  %v2306_v34 = vld [vmem:[%s3412_s4] ss:$0 sm:$0xff]  ;;  %s2753_s4 = smov 64  }
  0x19   :  { %2439 = vmatmul.mubr.msk.f32.vlgmr.msra.gmra.mxu1 %vm56_vm1, %v44_v8  ;;  %2441 = vmatprep.subr.mxu1 %v203_v9 }
  0x1a   :  { %2442 = vmatpush3.msra.mxu1 %v203_v9  ;;  %2491 = vmatprep.subr.mxu0 %v2749_v0 }
  0x1b   :  { %2443 = vmatprep.subr.mxu1 %v202_v10  ;;  %2492 = vmatpush3.msra.mxu0 %v2864_v28 }
  0x1c   :  { %2444 = vmatpush3.msra.mxu1 %v202_v10  ;;  %2496 = vmatprep.subr.mxu0 %v2749_v0  ;;  %v135_v10 = vld [vmem:[%s3409_s1 + $0x18] sm:$0xff] }
  0x1d   :  { %2445 = vmatprep.subr.mxu1 %v201_v13 }
  0x1e   :  { %2446 = vmatpush3.msra.mxu1 %v201_v13 }
  0x1f   :  { %2447 = vmatprep.subr.mxu1 %v200_v14 }
  0x20   :  { %2448 = vmatpush3.msra.mxu1 %v200_v14 }
  0x21   :  { %2449 = vmatprep.subr.mxu1 %v199_v15 }
  0x22   :  { %2450 = vmatpush3.msra.mxu1 %v199_v15 }
  0x23   :  { %2451 = vmatprep.subr.mxu1 %v198_v16 }
  0x24   :  { %2452 = vmatpush3.msra.mxu1 %v198_v16 }
  0x25   :  { %2453 = vmatprep.subr.mxu1 %v197_v17 }
  0x26   :  { %2454 = vmatpush3.msra.mxu1 %v197_v17 }
  0x27   :  { %2455 = vmatprep.subr.mxu1 %v196_v18 }
  0x28   :  { %2456 = vmatpush3.msra.mxu1 %v196_v18 }
  0x29   :  { %2457 = vmatprep.subr.mxu1 %v195_v19 }
  0x2a   :  { %2458 = vmatpush3.msra.mxu1 %v195_v19 }
  0x2b   :  { %2459 = vmatprep.subr.mxu1 %v194_v20 }
  0x2c   :  { %2460 = vmatpush3.msra.mxu1 %v194_v20 }
  0x2d   :  { %2461 = vmatprep.subr.mxu1 %v193_v21 }
  0x2e   :  { %2462 = vmatpush3.msra.mxu1 %v193_v21 }
  0x2f   :  { %2463 = vmatprep.subr.mxu1 %v192_v22 }
  0x30   :  { %2464 = vmatpush3.msra.mxu1 %v192_v22 }
  0x31   :  { %2465 = vmatprep.subr.mxu1 %v191_v23 }
  0x32   :  { %2466 = vmatpush3.msra.mxu1 %v191_v23 }
  0x33   :  { %2467 = vmatprep.subr.mxu1 %v190_v24 }
  0x34   :  { %2468 = vmatpush3.msra.mxu1 %v190_v24 }
  0x35   :  { %2469 = vmatprep.subr.mxu1 %v189_v25 }
  0x36   :  { %2470 = vmatpush3.msra.mxu1 %v189_v25 }
  0x37   :  { %2471 = vmatprep.subr.mxu1 %v188_v26 }
  0x38   :  { %2472 = vmatpush3.msra.mxu1 %v188_v26 }
  0x39   :  { %2540 = vmatprep.subr.mxu1 %v2749_v0 }
  0x8d   :  { %v142_v31 = vpop.permute.xlu0 %141 }
  0x8e   :  { %vm164_vm2 = vcmp.eq.s32.totalorder %v2869_v30, %v142_v31 }
  0x8f   :  { %2473 = vmatprep.mubr.msk.f32.mxu1 %vm164_vm2, %v2752_v32 }
  0x91   :  { %v145_v33 = vpop.permute.xlu0 %144 }
  0x92   :  { %vm165_vm3 = vcmp.eq.s32.totalorder %v2869_v30, %v145_v33 }
  0x93   :  { %2474 = vmatmul.mubr.msk.f32.vlgmr.msra.gmra.mxu1 %vm165_vm3, %v2752_v32 }
  0x94   :  { %2541 = vmatpush3.msra.mxu1 %v2841_v11 }
  0x95   :  { %2542 = vmatprep.subr.mxu1 %v2749_v0 }
  0x96   :  { %2543 = vmatpush3.msra.mxu1 %v2847_v12 }
  0x97   :  { %2544 = vmatprep.subr.mxu1 %v2749_v0 }
  0x98   :  { %2545 = vmatpush3.msra.mxu1 %v2857_v27 }
  0x99   :  { %2546 = vmatprep.subr.mxu1 %v2749_v0 }
  0x9a   :  { %2547 = vmatpush3.msra.mxu1 %v2864_v28 }
  0x9b   :  { %2562 = vmatprep.subr.mxu1 %v2749_v0 }
  0xd9   :  { %v126_v35 = vpop.f32.mrf.mxu1 }
  0xda   :  { %v127_v36 = vadd.f32 %v2306_v34, %v126_v35 }
  0xdb   :  { %v2440_v37 = vpop.f32.mrf.mxu1 }
  0xdc   :  { %2494 = vmatmul.mubr.msk.f32.vlgmr.msra.gmra.mxu0 %vm56_vm1, %v127_v36 }
  0xdd   :  { %2497 = vmatpush3.msra.mxu0 %v2841_v11  ;;  %2504 = vmatprep.mubr.msk.f32.mxu0 %vm2750_vm0, %v2749_v0 }
  0xde   :  { %2498 = vmatprep.subr.mxu0 %v2749_v0 }
  0xdf   :  { %2499 = vmatpush3.msra.mxu0 %v2847_v12 }
  0xe0   :  { %2500 = vmatprep.subr.mxu0 %v2749_v0 }
  0xe1   :  { %2501 = vmatpush3.msra.mxu0 %v2857_v27 }
  0xe2   :  { %2502 = vmatprep.subr.mxu0 %v2749_v0 }
  0xe3   :  { %2503 = vmatpush3.msra.mxu0 %v2864_v28 }
  0xe4   :  { %2507 = vmatprep.subr.mxu0 %v2749_v0 }
 0x153   :  { %v2475_v38 = vpop.f32.mrf.mxu1 }
 0x155   :  { %v270_v39 = vpop.f32.mrf.mxu1 }
 0x19c   :  { %v382_v40 = vpop.f32.mrf.mxu0 }
 0x19d   :  { %v386_v41 = vadd.f32 %v382_v40, %v270_v39 }
 0x19e   :  { %v2495_v42 = vpop.f32.mrf.mxu0 }
 0x19f   :  { %2606 = vtanh.f32 %v386_v41  ;;  %v2325_v44 = vmul.f32 -1.442695, %v386_v41 }
 0x1a1   :  { %2608 = vpow2.f32 %v2325_v44 }
 0x1ac   :  { %v2607_v43 = vpop.eup %2606 }
 0x1ad   :  { %396 = vrot.lane.b32.xlu1 %v2607_v43, %s2753_s4 }
 0x1ae   :  { %v2609_v45 = vpop.eup %2608 }
 0x1af   :  { %v390_v46 = vadd.f32 1.0, %v2609_v45 }
 0x1b1   :  { %2610 = vrcp.f32 %v390_v46 }
 0x1be   :  { %v2611_v47 = vpop.eup %2610 }
 0x1bf   :  { %v394_v50 = vmul.f32 %v2611_v47, %v127_v36 }
 0x21f   :  { %v397_v48 = vpop.permute.xlu1 %396 }
 0x220   :  { %v399_v49 = vmul.f32 %v2611_v47, %v397_v48 }
 0x222   :  { %401 = vrot.lane.b32.xlu1 %v399_v49, %s2754_s12 }
 0x294   :  { %v402_v51 = vpop.permute.xlu1 %401 }
 0x295   :  { %v404_v52 = vadd.f32 %v402_v51, %v394_v50  ;;  %v136_v51 = vld [vmem:[%s3409_s1 + $0x20] sm:$0xff] }
 0x297   :  { %2612 = vtanh.f32 %v404_v52 }
 0x2a4   :  { %v2613_v53 = vpop.eup %2612 }
 0x2a5   :  { %407 = vrot.lane.b32.xlu0 %v2613_v53, %s2753_s4 }
 0x317   :  { %v408_v54 = vpop.permute.xlu0 %407 }
 0x318   :  { %v2900_v55 = vmul.f32 %v2611_v47, %v408_v54 }
 0x31a   :  { %530 = vrot.lane.b32.xlu1 %v2900_v55, %s2754_s12 }
 0x38c   :  { %v531_v56 = vpop.permute.xlu1 %530 }
 0x38d   :  { %2505 = vmatmul.mubr.msk.f32.vlgmr.msra.gmra.mxu0 %vm56_vm1, %v531_v56 }
 0x38e   :  { %2508 = vmatpush3.msra.mxu0 %v2841_v11  ;;  %2515 = vmatprep.mubr.msk.f32.mxu0 %vm2750_vm0, %v2749_v0 }
 0x38f   :  { %2509 = vmatprep.subr.mxu0 %v2749_v0 }
 0x390   :  { %2510 = vmatpush3.msra.mxu0 %v2847_v12 }
 0x391   :  { %2511 = vmatprep.subr.mxu0 %v2749_v0 }
 0x392   :  { %2512 = vmatpush3.msra.mxu0 %v2857_v27 }
 0x393   :  { %2513 = vmatprep.subr.mxu0 %v2749_v0 }
 0x394   :  { %2514 = vmatpush3.msra.mxu0 %v2864_v28 }
 0x395   :  { %2518 = vmatprep.subr.mxu0 %v2749_v0 }
 0x44d   :  { %v600_v57 = vpop.f32.mrf.mxu0 }
 0x44e   :  { %v604_v58 = vadd.f32 %v2475_v38, %v600_v57 }
 0x44f   :  { %v2506_v59 = vpop.f32.mrf.mxu0 }
 0x450   :  { %2614 = vtanh.f32 %v604_v58  ;;  %v2327_v61 = vmul.f32 -1.442695, %v604_v58  ;;  %v137_v58 = vld [vmem:[%s3409_s1 + $0x28] sm:$0xff] }
 0x452   :  { %2616 = vpow2.f32 %v2327_v61 }
 0x45d   :  { %v2615_v60 = vpop.eup %2614 }
 0x45e   :  { %614 = vrot.lane.b32.xlu0 %v2615_v60, %s2753_s4 }
 0x45f   :  { %v2617_v62 = vpop.eup %2616 }
 0x460   :  { %v608_v63 = vadd.f32 1.0, %v2617_v62 }
 0x462   :  { %2618 = vrcp.f32 %v608_v63 }
 0x46f   :  { %v2619_v1 = vpop.eup %2618 }
 0x470   :  { %v612_v5 = vmul.f32 %v2619_v1, %v404_v52 }
 0x4d0   :  { %v615_v2 = vpop.permute.xlu0 %614 }
 0x4d1   :  { %v617_v3 = vmul.f32 %v2619_v1, %v615_v2 }
 0x4d3   :  { %619 = vrot.lane.b32.xlu1 %v617_v3, %s2754_s12 }
 0x4d7   :  { %147 = vperm.xlu1 %2605, %v134_v4  }
 0x545   :  { %v620_v6 = vpop.permute.xlu1 %619 }
 0x546   :  { %v622_v7 = vadd.f32 %v620_v6, %v612_v5 }
 0x548   :  { %2620 = vtanh.f32 %v622_v7 }
 0x552   :  { %v148_v8 = vpop.permute.xlu1 %147 }
 0x553   :  { %vm166_vm4 = vcmp.eq.s32.totalorder %v2869_v30, %v148_v8 }
 0x554   :  { %2476 = vmatprep.mubr.msk.f32.mxu1 %vm166_vm4, %v2752_v32 }
 0x555   :  { %v2621_v9 = vpop.eup %2620 }
 0x556   :  { %625 = vrot.lane.b32.xlu0 %v2621_v9, %s2753_s4 }
 0x55a   :  { %150 = vperm.xlu0 %2604, %v135_v10  }
 0x5c8   :  { %v626_v13 = vpop.permute.xlu0 %625 }
 0x5c9   :  { %v2926_v14 = vmul.f32 %v2619_v1, %v626_v13 }
 0x5cb   :  { %747 = vrot.lane.b32.xlu1 %v2926_v14, %s2754_s12 }
 0x5d5   :  { %v151_v15 = vpop.permute.xlu0 %150 }
 0x5d6   :  { %vm167_vm5 = vcmp.eq.s32.totalorder %v2869_v30, %v151_v15  ;;  %v138_v15 = vld [vmem:[%s3409_s1 + $0x30] sm:$0xff] }
 0x5d7   :  { %2477 = vmatmul.mubr.msk.f32.gmra.mxu1 %vm167_vm5, %v2752_v32 }
 0x63d   :  { %v748_v16 = vpop.permute.xlu1 %747 }
 0x63e   :  { %2516 = vmatmul.mubr.msk.f32.vlgmr.msra.gmra.mxu0 %vm56_vm1, %v748_v16 }
 0x63f   :  { %2519 = vmatpush3.msra.mxu0 %v2841_v11  ;;  %2526 = vmatprep.mubr.msk.f32.mxu0 %vm2750_vm0, %v2749_v0 }
 0x640   :  { %2520 = vmatprep.subr.mxu0 %v2749_v0 }
 0x641   :  { %2521 = vmatpush3.msra.mxu0 %v2847_v12 }
 0x642   :  { %2522 = vmatprep.subr.mxu0 %v2749_v0 }
 0x643   :  { %2523 = vmatpush3.msra.mxu0 %v2857_v27 }
 0x644   :  { %2524 = vmatprep.subr.mxu0 %v2749_v0 }
 0x645   :  { %2525 = vmatpush3.msra.mxu0 %v2864_v28 }
 0x646   :  { %2529 = vmatprep.subr.mxu0 %v2749_v0 }
 0x697   :  { %v2478_v17 = vpop.f32.mrf.mxu1 }
 0x699   :  { %v280_v18 = vpop.f32.mrf.mxu1 }
 0x6fe   :  { %v817_v19 = vpop.f32.mrf.mxu0 }
 0x6ff   :  { %v821_v20 = vadd.f32 %v817_v19, %v280_v18 }
 0x700   :  { %v2517_v21 = vpop.f32.mrf.mxu0 }
 0x701   :  { %2622 = vtanh.f32 %v821_v20  ;;  %v2329_v23 = vmul.f32 -1.442695, %v821_v20  ;;  %v139_v21 = vld [vmem:[%s3409_s1 + $0x38] sm:$0xff] }
 0x703   :  { %2624 = vpow2.f32 %v2329_v23 }
 0x70e   :  { %v2623_v22 = vpop.eup %2622 }
 0x70f   :  { %831 = vrot.lane.b32.xlu0 %v2623_v22, %s2753_s4 }
 0x710   :  { %v2625_v24 = vpop.eup %2624 }
 0x711   :  { %v825_v25 = vadd.f32 1.0, %v2625_v24 }
 0x713   :  { %2626 = vrcp.f32 %v825_v25 }
 0x720   :  { %v2627_v26 = vpop.eup %2626 }
 0x721   :  { %v829_v34 = vmul.f32 %v2627_v26, %v622_v7 }
 0x781   :  { %v832_v31 = vpop.permute.xlu0 %831 }
 0x782   :  { %v834_v33 = vmul.f32 %v2627_v26, %v832_v31 }
 0x784   :  { %836 = vrot.lane.b32.xlu1 %v834_v33, %s2754_s12 }
 0x7f6   :  { %v837_v35 = vpop.permute.xlu1 %836 }
 0x7f7   :  { %v839_v36 = vadd.f32 %v837_v35, %v829_v34 }
 0x7f9   :  { %2628 = vtanh.f32 %v839_v36 }
 0x806   :  { %v2629_v37 = vpop.eup %2628 }
 0x807   :  { %842 = vrot.lane.b32.xlu0 %v2629_v37, %s2753_s4 }
 0x879   :  { %v843_v38 = vpop.permute.xlu0 %842 }
 0x87a   :  { %v2946_v39 = vmul.f32 %v2627_v26, %v843_v38 }
 0x87c   :  { %964 = vrot.lane.b32.xlu1 %v2946_v39, %s2754_s12 }
 0x8ee   :  { %v965_v40 = vpop.permute.xlu1 %964 }
 0x8ef   :  { %2527 = vmatmul.mubr.msk.f32.vlgmr.msra.gmra.mxu0 %vm56_vm1, %v965_v40 }
 0x8f0   :  { %2530 = vmatpush3.msra.mxu0 %v2841_v11  ;;  %2537 = vmatprep.mubr.msk.f32.mxu0 %vm2750_vm0, %v2749_v0 }
 0x8f1   :  { %2531 = vmatprep.subr.mxu0 %v2749_v0 }
 0x8f2   :  { %2532 = vmatpush3.msra.mxu0 %v2847_v12 }
 0x8f3   :  { %2533 = vmatprep.subr.mxu0 %v2749_v0 }
 0x8f4   :  { %2534 = vmatpush3.msra.mxu0 %v2857_v27 }
 0x8f5   :  { %2535 = vmatprep.subr.mxu0 %v2749_v0 }
 0x8f6   :  { %2536 = vmatpush3.msra.mxu0 %v2864_v28 }
 0x8f7   :  { %2551 = vmatprep.subr.mxu0 %v2749_v0 }
 0x9af   :  { %v1034_v41 = vpop.f32.mrf.mxu0 }
 0x9b0   :  { %v1038_v42 = vadd.f32 %v2478_v17, %v1034_v41 }
 0x9b1   :  { %v2528_v43 = vpop.f32.mrf.mxu0 }
 0x9b2   :  { %2630 = vtanh.f32 %v1038_v42  ;;  %v2331_v45 = vmul.f32 -1.442695, %v1038_v42 }
 0x9b4   :  { %2632 = vpow2.f32 %v2331_v45 }
 0x9bf   :  { %v2631_v44 = vpop.eup %2630 }
 0x9c0   :  { %1048 = vrot.lane.b32.xlu0 %v2631_v44, %s2753_s4 }
 0x9c1   :  { %v2633_v46 = vpop.eup %2632 }
 0x9c2   :  { %v1042_v47 = vadd.f32 1.0, %v2633_v46 }
 0x9c4   :  { %2634 = vrcp.f32 %v1042_v47 }
 0x9d1   :  { %v2635_v48 = vpop.eup %2634 }
 0x9d2   :  { %v1046_v52 = vmul.f32 %v2635_v48, %v839_v36 }
 0xa32   :  { %v1049_v49 = vpop.permute.xlu0 %1048 }
 0xa33   :  { %v1051_v50 = vmul.f32 %v2635_v48, %v1049_v49 }
 0xa35   :  { %1053 = vrot.lane.b32.xlu1 %v1051_v50, %s2754_s12 }
 0xa39   :  { %153 = vperm.xlu1 %2605, %v136_v51  }
 0xaa7   :  { %v1054_v53 = vpop.permute.xlu1 %1053 }
 0xaa8   :  { %v1056_v54 = vadd.f32 %v1054_v53, %v1046_v52 }
 0xaaa   :  { %2636 = vtanh.f32 %v1056_v54 }
 0xab4   :  { %v154_v56 = vpop.permute.xlu1 %153 }
 0xab5   :  { %vm168_vm6 = vcmp.eq.s32.totalorder %v2869_v30, %v154_v56 }
 0xab6   :  { %2479 = vmatprep.mubr.msk.f32.mxu1 %vm168_vm6, %v2752_v32 }
 0xab7   :  { %v2637_v57 = vpop.eup %2636 }
 0xab8   :  { %1059 = vrot.lane.b32.xlu0 %v2637_v57, %s2753_s4 }
 0xabc   :  { %156 = vperm.xlu0 %2604, %v137_v58  }
 0xb2a   :  { %v1060_v59 = vpop.permute.xlu0 %1059 }
 0xb2b   :  { %v2972_v60 = vmul.f32 %v2635_v48, %v1060_v59 }
 0xb2d   :  { %1181 = vrot.lane.b32.xlu1 %v2972_v60, %s2754_s12 }
 0xb37   :  { %v157_v61 = vpop.permute.xlu0 %156 }
 0xb38   :  { %vm169_vm7 = vcmp.eq.s32.totalorder %v2869_v30, %v157_v61 }
 0xb39   :  { %2480 = vmatmul.mubr.msk.f32.gmra.mxu1 %vm169_vm7, %v2752_v32 }
 0xb9f   :  { %v1182_v62 = vpop.permute.xlu1 %1181 }
 0xba0   :  { %2538 = vmatmul.mubr.msk.f32.vlgmr.msra.gmra.mxu0 %vm56_vm1, %v1182_v62 }
 0xba1   :  { %2552 = vmatpush3.msra.mxu0 %v2841_v11  ;;  %2559 = vmatprep.mubr.msk.f32.mxu0 %vm2750_vm0, %v2749_v0 }
 0xba2   :  { %2553 = vmatprep.subr.mxu0 %v2749_v0 }
 0xba3   :  { %2554 = vmatpush3.msra.mxu0 %v2847_v12 }
 0xba4   :  { %2555 = vmatprep.subr.mxu0 %v2749_v0 }
 0xba5   :  { %2556 = vmatpush3.msra.mxu0 %v2857_v27 }
 0xba6   :  { %2557 = vmatprep.subr.mxu0 %v2749_v0 }
 0xba7   :  { %2558 = vmatpush3.msra.mxu0 %v2864_v28 }
 0xbf9   :  { %v2481_v63 = vpop.f32.mrf.mxu1 }
 0xbfb   :  { %v290_v1 = vpop.f32.mrf.mxu1 }
 0xc60   :  { %v1251_v2 = vpop.f32.mrf.mxu0 }
 0xc61   :  { %v1255_v3 = vadd.f32 %v1251_v2, %v290_v1  ;;  %v2755_v1 = vmov 1966171168  }
 0xc62   :  { %v2539_v4 = vpop.f32.mrf.mxu0  ;;  %v414_v2 = vunpack.c.l.s4 %v2755_v1 }
 0xc63   :  { %2638 = vtanh.f32 %v1255_v3  ;;  %v2333_v6 = vmul.f32 -1.442695, %v1255_v3 }
 0xc65   :  { %2640 = vpow2.f32 %v2333_v6  ;;  %v417_v6 = vshrl.u32 %v130_v29, 7 }
 0xc70   :  { %v2639_v5 = vpop.eup %2638 }
 0xc71   :  { %1265 = vrot.lane.b32.xlu0 %v2639_v5, %s2753_s4  ;;  %v415_v5 = vunpack.c.0.s8 %v414_v2 }
 0xc72   :  { %v2641_v7 = vpop.eup %2640 }
 0xc73   :  { %v1259_v8 = vadd.f32 1.0, %v2641_v7  ;;  %v3037_v7 = vsub.s32 %v415_v5, %v417_v6 }
 0xc75   :  { %2642 = vrcp.f32 %v1259_v8  ;;  %v637_v8 = vrot.slane %v2926_v14, %v3037_v7 }
 0xc82   :  { %v2643_v9 = vpop.eup %2642 }
 0xc83   :  { %v1263_v16 = vmul.f32 %v2643_v9, %v1056_v54 }
 0xce3   :  { %v1266_v10 = vpop.permute.xlu0 %1265 }
 0xce4   :  { %v1268_v13 = vmul.f32 %v2643_v9, %v1266_v10  ;;  %v653_v10 = vrot.slane %v637_v8, %v3037_v7 }
 0xce6   :  { %1270 = vrot.lane.b32.xlu1 %v1268_v13, %s2754_s12 }
 0xcea   :  { %159 = vperm.xlu1 %2605, %v138_v15   ;;  %v3044_v15 = vsub.s32 0, %v417_v6 }
 0xcec   :  { %v682_v29 = vrot.slane %v653_v10, %v3044_v15 }
 0xd58   :  { %v1271_v17 = vpop.permute.xlu1 %1270 }
 0xd59   :  { %v1273_v18 = vadd.f32 %v1271_v17, %v1263_v16 }
 0xd5b   :  { %2644 = vtanh.f32 %v1273_v18 }
 0xd65   :  { %v160_v19 = vpop.permute.xlu1 %159 }
 0xd66   :  { %vm170_vm8 = vcmp.eq.s32.totalorder %v2869_v30, %v160_v19 }
 0xd67   :  { %2482 = vmatprep.mubr.msk.f32.mxu1 %vm170_vm8, %v2752_v32 }
 0xd68   :  { %v2645_v20 = vpop.eup %2644 }
 0xd69   :  { %1276 = vrot.lane.b32.xlu0 %v2645_v20, %s2753_s4  ;;  %v645_v20 = vcombine.high %v637_v8, %v637_v8 }
 0xd6d   :  { %162 = vperm.xlu0 %2604, %v139_v21  }
 0xddb   :  { %v1277_v22 = vpop.permute.xlu0 %1276 }
 0xddc   :  { %v2999_v23 = vmul.f32 %v2643_v9, %v1277_v22  ;;  %v1071_v9 = vrot.slane %v2972_v60, %v3037_v7  ;;  %v667_v22 = vrot.slane %v645_v20, %v3037_v7 }
 0xdde   :  { %1398 = vrot.lane.b32.xlu1 %v2999_v23, %s2754_s12  ;;  %v1087_v17 = vrot.slane %v1071_v9, %v3037_v7 }
 0xde8   :  { %v163_v24 = vpop.permute.xlu0 %162 }
 0xde9   :  { %vm171_vm9 = vcmp.eq.s32.totalorder %v2869_v30, %v163_v24  ;;  %v1079_v24 = vcombine.high %v1071_v9, %v1071_v9 }
 0xdea   :  { %2483 = vmatmul.mubr.msk.f32.gmra.mxu1 %vm171_vm9, %v2752_v32 }
 0xdeb   :  { %2548 = vmatprep.mubr.msk.f32.mxu1 %vm2750_vm0, %v2749_v0 }
 0xe50   :  { %v1399_v25 = vpop.permute.xlu1 %1398 }
 0xe51   :  { %2549 = vmatmul.mubr.msk.f32.vlgmr.msra.gmra.mxu1 %vm56_vm1, %v1399_v25 }
 0xe52   :  { %2563 = vmatpush3.msra.mxu1 %v2841_v11  ;;  %2570 = vmatprep.mubr.msk.f32.mxu1 %vm2750_vm0, %v2749_v0 }
 0xe53   :  { %2564 = vmatprep.subr.mxu1 %v2749_v0 }
 0xe54   :  { %2565 = vmatpush3.msra.mxu1 %v2847_v12 }
 0xe55   :  { %2566 = vmatprep.subr.mxu1 %v2749_v0 }
 0xe56   :  { %2567 = vmatpush3.msra.mxu1 %v2857_v27 }
 0xe57   :  { %2568 = vmatprep.subr.mxu1 %v2749_v0 }
 0xe58   :  { %2569 = vmatpush3.msra.mxu1 %v2864_v28 }
 0xeaa   :  { %v2484_v30 = vpop.f32.mrf.mxu1 }
 0xeac   :  { %v300_v32 = vpop.f32.mrf.mxu1 }
 0xf11   :  { %v1468_v26 = vpop.f32.mrf.mxu1 }
 0xf12   :  { %v1472_v31 = vadd.f32 %v2481_v63, %v1468_v26 }
 0xf13   :  { %v2550_v11 = vpop.f32.mrf.mxu1 }
 0xf14   :  { %2646 = vtanh.f32 %v1472_v31  ;;  %v2335_v34 = vmul.f32 -1.442695, %v1472_v31 }
 0xf16   :  { %2648 = vpow2.f32 %v2335_v34 }
 0xf21   :  { %v2647_v33 = vpop.eup %2646 }
 0xf22   :  { %1482 = vrot.lane.b32.xlu0 %v2647_v33, %s2753_s4  ;;  %v675_v33 = vcombine.high %v653_v10, %v653_v10 }
 0xf23   :  { %v2649_v12 = vpop.eup %2648 }
 0xf24   :  { %v1476_v35 = vadd.f32 1.0, %v2649_v12  ;;  %v690_v34 = vrot.slane %v675_v33, %v3044_v15  ;;  %v1109_v12 = vcombine.high %v1087_v17, %v1087_v17 }
 0xf26   :  { %2650 = vrcp.f32 %v1476_v35  ;;  %v1124_v35 = vrot.slane %v1109_v12, %v3044_v15 }
 0xf33   :  { %v2651_v36 = vpop.eup %2650 }
 0xf34   :  { %v1480_v0 = vmul.f32 %v2651_v36, %v1273_v18  ;;  %v1116_v18 = vrot.slane %v1087_v17, %v3044_v15 }
 0xf94   :  { %v1483_v27 = vpop.permute.xlu0 %1482 }
 0xf95   :  { %v1485_v37 = vmul.f32 %v2651_v36, %v1483_v27 }
 0xf97   :  { %1487 = vrot.lane.b32.xlu1 %v1485_v37, %s2754_s12  ;;  %v677_v37 = vcombine.high %v667_v22, %v667_v22 }
0x1009   :  { %v1488_v28 = vpop.permute.xlu1 %1487 }
0x100a   :  { %v1490_v38 = vadd.f32 %v1488_v28, %v1480_v0  ;;  %v694_v0 = vrot.slane %v677_v37, %v3044_v15 }
0x100c   :  { %2652 = vtanh.f32 %v1490_v38 }
0x1019   :  { %v2653_v40 = vpop.eup %2652 }
0x101a   :  { %1493 = vrot.lane.b32.xlu0 %v2653_v40, %s2753_s4 }
0x108c   :  { %v1494_v41 = vpop.permute.xlu0 %1493 }
0x108d   :  { %v3020_v42 = vmul.f32 %v2651_v36, %v1494_v41 }
0x108f   :  { %1615 = vrot.lane.b32.xlu1 %v3020_v42, %s2754_s12  ;;  %v1505_v16 = vrot.slane %v3020_v42, %v3037_v7 }
0x1091   :  { %v1521_v19 = vrot.slane %v1505_v16, %v3037_v7  ;;  %v1513_v25 = vcombine.high %v1505_v16, %v1505_v16 }
0x1093   :  { %v1550_v21 = vrot.slane %v1521_v19, %v3044_v15  ;;  %v1535_v31 = vrot.slane %v1513_v25, %v3037_v7  ;;  %v1543_v36 = vcombine.high %v1521_v19, %v1521_v19 }
0x1095   :  { %v1554_v11 = vrot.slane %v1535_v31, %v3044_v15  ;;  %v1558_v27 = vrot.slane %v1543_v36, %v3044_v15  ;;  %v1545_v40 = vcombine.high %v1535_v31, %v1535_v31 }
0x1097   :  { %v1562_v41 = vrot.slane %v1545_v40, %v3044_v15 }
0x1101   :  { %v1616_v43 = vpop.permute.xlu1 %1615 }
0x1102   :  { %2560 = vmatmul.mubr.msk.f32.vlgmr.msra.gmra.mxu0 %vm56_vm1, %v1616_v43 }
0x11c2   :  { %v1685_v44 = vpop.f32.mrf.mxu0 }
0x11c3   :  { %v1689_v45 = vadd.f32 %v1685_v44, %v300_v32  ;;  %v1101_v32 = vrot.slane %v1079_v24, %v3037_v7 }
0x11c4   :  { %v2561_v46 = vpop.f32.mrf.mxu0 }
0x11c5   :  { %2654 = vtanh.f32 %v1689_v45  ;;  %v2337_v48 = vmul.f32 -1.442695, %v1689_v45  ;;  %v1120_v26 = vrot.slane %v1101_v32, %v3044_v15  ;;  %v1111_v28 = vcombine.high %v1101_v32, %v1101_v32 }
0x11c6   :  { %v419_v46 = vrot.slane %v2900_v55, %v3037_v7 }
0x11c7   :  { %2656 = vpow2.f32 %v2337_v48 }
0x11d2   :  { %v2655_v47 = vpop.eup %2654 }
0x11d3   :  { %1699 = vrot.lane.b32.xlu0 %v2655_v47, %s2753_s4 }
0x11d4   :  { %v2657_v49 = vpop.eup %2656 }
0x11d5   :  { %v1693_v50 = vadd.f32 1.0, %v2657_v49  ;;  %v854_v49 = vrot.slane %v2946_v39, %v3037_v7 }
0x11d7   :  { %2658 = vrcp.f32 %v1693_v50  ;;  %v862_v9 = vcombine.high %v854_v49, %v854_v49 }
0x11e4   :  { %v2659_v51 = vpop.eup %2658 }
0x11e5   :  { %v1697_v54 = vmul.f32 %v2659_v51, %v1490_v38  ;;  %v1128_v38 = vrot.slane %v1111_v28, %v3044_v15 }
0x1245   :  { %v1700_v52 = vpop.permute.xlu0 %1699 }
0x1246   :  { %v1702_v53 = vmul.f32 %v2659_v51, %v1700_v52 }
0x1248   :  { %1704 = vrot.lane.b32.xlu1 %v1702_v53, %s2754_s12  ;;  %v1288_v53 = vrot.slane %v2999_v23, %v3037_v7 }
0x12ba   :  { %v1705_v56 = vpop.permute.xlu1 %1704 }
0x12bb   :  { %v3027_v57 = vadd.f32 %v1705_v56, %v1697_v54  ;;  %v870_v56 = vrot.slane %v854_v49, %v3037_v7 }
0x12bd   :  { %2660 = vtanh.f32 %v3027_v57 }
0x12ca   :  { %v2661_v58 = vpop.eup %2660 }
0x12cb   :  { %1710 = vrot.lane.b32.xlu0 %v2661_v58, %s2753_s4 }
0x133d   :  { %v1711_v59 = vpop.permute.xlu0 %1710 }
0x133e   :  { %v3031_v61 = vmul.f32 %v2659_v51, %v1711_v59  ;;  %v435_v51 = vrot.slane %v419_v46, %v3037_v7 }
0x1340   :  { %1832 = vrot.lane.b32.xlu1 %v3031_v61, %s2754_s12  ;;  %v464_v54 = vrot.slane %v435_v51, %v3044_v15  ;;  %v1722_v59 = vrot.slane %v3031_v61, %v3037_v7  ;;  %v457_v32 = vcombine.high %v435_v51, %v435_v51 }
0x1342   :  { %v472_v31 = vrot.slane %v457_v32, %v3044_v15 }
0x13b2   :  { %v1833_v62 = vpop.permute.xlu1 %1832 }
0x13b3   :  { %2571 = vmatmul.mubr.msk.f32.vlgmr.msra.gmra.mxu1 %vm56_vm1, %v1833_v62  ;;  %v899_v62 = vrot.slane %v870_v56, %v3044_v15 }
0x1473   :  { %v1902_v63 = vpop.f32.mrf.mxu1 }
0x1474   :  { %v1906_v3 = vadd.f32 %v2484_v30, %v1902_v63  ;;  %v686_v30 = vrot.slane %v667_v22, %v3044_v15  ;;  %v1304_v63 = vrot.slane %v1288_v53, %v3037_v7 }
0x1475   :  { %v2572_v4 = vpop.f32.mrf.mxu1 }
0x1476   :  { %2662 = vtanh.f32 %v1906_v3  ;;  %v2339_v43 = vmul.f32 -1.442695, %v1906_v3  ;;  %v1333_v2 = vrot.slane %v1304_v63, %v3044_v15  ;;  %v1738_v3 = vrot.slane %v1722_v59, %v3037_v7 }
0x1477   :  { %v427_v4 = vcombine.high %v419_v46, %v419_v46  ;;  %v1326_v12 = vcombine.high %v1304_v63, %v1304_v63 }
0x1478   :  { %2664 = vpow2.f32 %v2339_v43  ;;  %v1767_v6 = vrot.slane %v1738_v3, %v3044_v15 }
0x1479   :  { %v449_v8 = vrot.slane %v427_v4, %v3037_v7  ;;  %v1341_v36 = vrot.slane %v1326_v12, %v3044_v15 }
0x147b   :  { %v468_v16 = vrot.slane %v449_v8, %v3044_v15  ;;  %v459_v28 = vcombine.high %v449_v8, %v449_v8 }
0x1483   :  { %v2663_v13 = vpop.eup %2662 }
0x1484   :  { %1916 = vrot.lane.b32.xlu0 %v2663_v13, %s2753_s4  ;;  %v1296_v13 = vcombine.high %v1288_v53, %v1288_v53  ;;  %v1715_v53 = vcombine.high %v3031_v61, %v3031_v61 }
0x1485   :  { %v2665_v44 = vpop.eup %2664 }
0x1486   :  { %v1910_v45 = vadd.f32 1.0, %v2665_v44  ;;  %v1318_v20 = vrot.slane %v1296_v13, %v3037_v7 }
0x1488   :  { %711 = vrot.lane.b32.xlu0 %v682_v29, %s2754_s12  ;;  %2666 = vrcp.f32 %v1910_v45  ;;  %v884_v29 = vrot.slane %v862_v9, %v3037_v7  ;;  %v1337_v22 = vrot.slane %v1318_v20, %v3044_v15  ;;  %v1328_v44 = vcombine.high %v1318_v20, %v1318_v20 }
0x1489   :  { %v847_v45 = vcombine.high %v2946_v39, %v2946_v39 }
0x148a   :  { %v903_v19 = vrot.slane %v884_v29, %v3044_v15  ;;  %v894_v40 = vcombine.high %v884_v29, %v884_v29  ;;  %v1345_v46 = vrot.slane %v1328_v44, %v3044_v15 }
0x148c   :  { %1145 = vrot.lane.b32.xlu0 %v1116_v18, %s2754_s12  ;;  %v1730_v18 = vcombine.high %v1722_v59, %v1722_v59  ;;  %v911_v43 = vrot.slane %v894_v40, %v3044_v15 }
0x148e   :  { %v1752_v24 = vrot.slane %v1730_v18, %v3037_v7 }
0x1490   :  { %1579 = vrot.lane.b32.xlu0 %v1550_v21, %s2754_s12 }
0x1494   :  { %713 = vrot.lane.b32.xlu0 %v686_v30, %s2754_s12  ;;  %v1771_v30 = vrot.slane %v1752_v24, %v3044_v15 }
0x1495   :  { %v3080_v47 = vpop.eup %2666 }
0x1496   :  { %v1914_v32 = vmul.f32 %v3080_v47, %v3027_v57 }
0x1498   :  { %1147 = vrot.lane.b32.xlu0 %v1120_v26, %s2754_s12 }
0x149c   :  { %1581 = vrot.lane.b32.xlu0 %v1554_v11, %s2754_s12  ;;  %v892_v11 = vcombine.high %v870_v56, %v870_v56 }
0x14a0   :  { %715 = vrot.lane.b32.xlu0 %v690_v34, %s2754_s12  ;;  %v907_v34 = vrot.slane %v892_v11, %v3044_v15 }
0x14a4   :  { %1149 = vrot.lane.b32.xlu0 %v1124_v35, %s2754_s12 }
0x14a8   :  { %1583 = vrot.lane.b32.xlu0 %v1558_v27, %s2754_s12  ;;  %v1760_v27 = vcombine.high %v1738_v3, %v1738_v3 }
0x14ac   :  { %717 = vrot.lane.b32.xlu0 %v694_v0, %s2754_s12  ;;  %v1775_v0 = vrot.slane %v1760_v27, %v3044_v15 }
0x14b0   :  { %1151 = vrot.lane.b32.xlu0 %v1128_v38, %s2754_s12  ;;  %v476_v38 = vrot.slane %v459_v28, %v3044_v15 }
0x14b4   :  { %1585 = vrot.lane.b32.xlu0 %v1562_v41, %s2754_s12  ;;  %v412_v41 = vcombine.high %v2900_v55, %v2900_v55 }
0x14b6   :  { %v426_v49 = vrot.slane %v412_v41, %v3037_v7 }
0x14b8   :  { %v442_v51 = vrot.slane %v426_v49, %v3037_v7 }
0x14f6   :  { %v1917_v48 = vpop.permute.xlu0 %1916 }
0x14f7   :  { %v1919_v50 = vmul.f32 %v3080_v47, %v1917_v48  ;;  %v1762_v48 = vcombine.high %v1752_v24, %v1752_v24 }
0x14f9   :  { %1921 = vrot.lane.b32.xlu1 %v1919_v50, %s2754_s12  ;;  %v1281_v50 = vcombine.high %v2999_v23, %v2999_v23  ;;  %v1779_v55 = vrot.slane %v1762_v48, %v3044_v15  ;;  %v1729_v23 = vrot.slane %v1715_v53, %v3037_v7 }
0x14fa   :  { %v712_v52 = vpop.permute.xlu0 %711 }
0x14fb   :  { %735 = vst.msk [vmem:[#allocation2 + $0x1] sm:$0x1] %vm517_vm10, %v712_v52  ;;  %v861_v52 = vrot.slane %v847_v45, %v3037_v7  ;;  %v1295_v39 = vrot.slane %v1281_v50, %v3037_v7  ;;  %v1745_v63 = vrot.slane %v1729_v23, %v3037_v7 }
0x14fd   :  { %493 = vrot.lane.b32.xlu1 %v464_v54, %s2754_s12  ;;  %v480_v54 = vrot.slane %v442_v51, %v3044_v15  ;;  %v877_v56 = vrot.slane %v861_v52, %v3037_v7  ;;  %v1311_v59 = vrot.slane %v1295_v39, %v3037_v7  ;;  %v1783_v61 = vrot.slane %v1745_v63, %v3044_v15 }
0x14fe   :  { %v1146_v58 = vpop.permute.xlu0 %1145  ;;  %v863_v3 = vcombine.high %v861_v52, %v861_v52  ;;  %v1761_v24 = vcombine.high %v1745_v63, %v1745_v63 }
0x14ff   :  { %1169 = vst.msk [vmem:[#allocation2 + $0x3] sm:$0x1] %vm517_vm10, %v1146_v58  ;;  %v915_v58 = vrot.slane %v877_v56, %v3044_v15 }
0x1501   :  { %928 = vrot.lane.b32.xlu1 %v899_v62, %s2754_s12  ;;  %v1349_v62 = vrot.slane %v1311_v59, %v3044_v15 }
0x1502   :  { %v1580_v1 = vpop.permute.xlu0 %1579 }
0x1503   :  { %1603 = vst.msk [vmem:[#allocation2 + $0x5] sm:$0x1] %vm517_vm10, %v1580_v1  ;;  %v428_v1 = vcombine.high %v426_v49, %v426_v49 }
0x1505   :  { %1362 = vrot.lane.b32.xlu1 %v1333_v2, %s2754_s12  ;;  %v456_v2 = vrot.slane %v428_v1, %v3037_v7 }
0x1506   :  { %v714_v5 = vpop.permute.xlu0 %713 }
0x1507   :  { %736 = vst.msk [vmem:[#allocation2 + $0x9] sm:$0x1] %vm517_vm10, %v714_v5  ;;  %v484_v4 = vrot.slane %v456_v2, %v3044_v15  ;;  %v891_v5 = vrot.slane %v863_v3, %v3037_v7 }
0x1509   :  { %1796 = vrot.lane.b32.xlu1 %v1767_v6, %s2754_s12  ;;  %v1297_v6 = vcombine.high %v1295_v39, %v1295_v39  ;;  %v919_v8 = vrot.slane %v891_v5, %v3044_v15  ;;  %v895_v11 = vcombine.high %v891_v5, %v891_v5 }
0x150a   :  { %v1148_v10 = vpop.permute.xlu0 %1147 }
0x150b   :  { %1170 = vst.msk [vmem:[#allocation2 + $0xb] sm:$0x1] %vm517_vm10, %v1148_v10  ;;  %v1325_v9 = vrot.slane %v1297_v6, %v3037_v7  ;;  %v1731_v10 = vcombine.high %v1729_v23, %v1729_v23 }
0x150d   :  { %495 = vrot.lane.b32.xlu1 %v468_v16, %s2754_s12  ;;  %v1353_v13 = vrot.slane %v1325_v9, %v3044_v15  ;;  %v1759_v16 = vrot.slane %v1731_v10, %v3037_v7 }
0x150e   :  { %v1582_v17 = vpop.permute.xlu0 %1581 }
0x150f   :  { %1604 = vst.msk [vmem:[#allocation2 + $0xd] sm:$0x1] %vm517_vm10, %v1582_v17  ;;  %v1787_v29 = vrot.slane %v1759_v16, %v3044_v15  ;;  %v458_v17 = vcombine.high %v442_v51, %v442_v51  ;;  %v1763_v57 = vcombine.high %v1759_v16, %v1759_v16 }
0x1511   :  { %930 = vrot.lane.b32.xlu1 %v903_v19, %s2754_s12  ;;  %v488_v18 = vrot.slane %v458_v17, %v3044_v15  ;;  %v893_v19 = vcombine.high %v877_v56, %v877_v56  ;;  %v1795_v40 = vrot.slane %v1763_v57, %v3044_v15 }
0x1512   :  { %v716_v21 = vpop.permute.xlu0 %715 }
0x1513   :  { %737 = vst.msk [vmem:[#allocation2 + $0x11] sm:$0x1] %vm517_vm10, %v716_v21  ;;  %v923_v20 = vrot.slane %v893_v19, %v3044_v15  ;;  %v1327_v21 = vcombine.high %v1311_v59, %v1311_v59 }
0x1515   :  { %1364 = vrot.lane.b32.xlu1 %v1337_v22, %s2754_s12  ;;  %v1357_v22 = vrot.slane %v1327_v21, %v3044_v15 }
0x1516   :  { %v1150_v25 = vpop.permute.xlu0 %1149 }
0x1517   :  { %1171 = vst.msk [vmem:[#allocation2 + $0x13] sm:$0x1] %vm517_vm10, %v1150_v25  ;;  %v1791_v25 = vrot.slane %v1761_v24, %v3044_v15 }
0x1519   :  { %1798 = vrot.lane.b32.xlu1 %v1771_v30, %s2754_s12  ;;  %v460_v30 = vcombine.high %v456_v2, %v456_v2 }
0x151a   :  { %v1584_v26 = vpop.permute.xlu0 %1583 }
0x151b   :  { %1605 = vst.msk [vmem:[#allocation2 + $0x15] sm:$0x1] %vm517_vm10, %v1584_v26 }
0x151d   :  { %497 = vrot.lane.b32.xlu1 %v472_v31, %s2754_s12  ;;  %v492_v31 = vrot.slane %v460_v30, %v3044_v15 }
0x151e   :  { %v718_v33 = vpop.permute.xlu0 %717 }
0x151f   :  { %738 = vst.msk [vmem:[#allocation2 + $0x19] sm:$0x1] %vm517_vm10, %v718_v33 }
0x1521   :  { %932 = vrot.lane.b32.xlu1 %v907_v34, %s2754_s12  ;;  %v1329_v34 = vcombine.high %v1325_v9, %v1325_v9 }
0x1522   :  { %v1152_v35 = vpop.permute.xlu0 %1151 }
0x1523   :  { %1172 = vst.msk [vmem:[#allocation2 + $0x1b] sm:$0x1] %vm517_vm10, %v1152_v35  ;;  %v927_v35 = vrot.slane %v895_v11, %v3044_v15 }
0x1525   :  { %1366 = vrot.lane.b32.xlu1 %v1341_v36, %s2754_s12  ;;  %v630_v36 = vcombine.high %v2926_v14, %v2926_v14  ;;  %v1498_v14 = vcombine.high %v3020_v42, %v3020_v42 }
0x1526   :  { %v1586_v37 = vpop.permute.xlu0 %1585 }
0x1527   :  { %1606 = vst.msk [vmem:[#allocation2 + $0x1d] sm:$0x1] %vm517_vm10, %v1586_v37  ;;  %v1361_v37 = vrot.slane %v1329_v34, %v3044_v15  ;;  %v644_v28 = vrot.slane %v630_v36, %v3037_v7 }
0x1529   :  { %1800 = vrot.lane.b32.xlu1 %v1775_v0, %s2754_s12  ;;  %v1064_v0 = vcombine.high %v2972_v60, %v2972_v60  ;;  %v660_v41 = vrot.slane %v644_v28, %v3037_v7  ;;  %v1512_v60 = vrot.slane %v1498_v14, %v3037_v7  ;;  %v2056_v14 = vld [vmem:[%s3414_s6 + $0x18] sm:$0xff] }
0x152a   :  { %2573 = vmatprep.subr.mxu0 %v2056_v14 }
0x152b   :  { %v1528_v50 = vrot.slane %v1512_v60, %v3037_v7  ;;  %v676_v2 = vcombine.high %v660_v41, %v660_v41  ;;  %2574 = vmatpush3.msra.mxu0 %v2056_v14 }
0x152d   :  { %499 = vrot.lane.b32.xlu1 %v476_v38, %s2754_s12  ;;  %v1566_v52 = vrot.slane %v1528_v50, %v3044_v15  ;;  %v1544_v9 = vcombine.high %v1528_v50, %v1528_v50 }
0x1531   :  { %934 = vrot.lane.b32.xlu1 %v911_v43, %s2754_s12  ;;  %v1078_v43 = vrot.slane %v1064_v0, %v3037_v7 }
0x1533   :  { %v1094_v48 = vrot.slane %v1078_v43, %v3037_v7  ;;  %v1080_v53 = vcombine.high %v1078_v43, %v1078_v43 }
0x1535   :  { %1368 = vrot.lane.b32.xlu1 %v1345_v46, %s2754_s12  ;;  %v698_v46 = vrot.slane %v660_v41, %v3044_v15  ;;  %v1132_v42 = vrot.slane %v1094_v48, %v3044_v15  ;;  %v1108_v23 = vrot.slane %v1080_v53, %v3037_v7  ;;  %v1110_v5 = vcombine.high %v1094_v48, %v1094_v48  ;;  %v2055_v41 = vld [vmem:[%s3414_s6 + $0x10] sm:$0xff] }
0x1536   :  { %2575 = vmatprep.subr.mxu0 %v2055_v41 }
0x1537   :  { %2576 = vmatpush3.msra.mxu0 %v2055_v41 }
0x1539   :  { %1802 = vrot.lane.b32.xlu1 %v1779_v55, %s2754_s12  ;;  %v646_v55 = vcombine.high %v644_v28, %v644_v28 }
0x153b   :  { %v674_v39 = vrot.slane %v646_v55, %v3037_v7 }
0x153d   :  { %501 = vrot.lane.b32.xlu1 %v480_v54, %s2754_s12  ;;  %v702_v56 = vrot.slane %v674_v39, %v3044_v15  ;;  %v678_v16 = vcombine.high %v674_v39, %v674_v39 }
0x153f   :  { %v710_v17 = vrot.slane %v678_v16, %v3044_v15 }
0x1541   :  { %936 = vrot.lane.b32.xlu1 %v915_v58, %s2754_s12  ;;  %v1514_v58 = vcombine.high %v1512_v60, %v1512_v60  ;;  %v2054_v60 = vld [vmem:[%s3414_s6 + $0x8] sm:$0xff] }
0x1542   :  { %2577 = vmatprep.subr.mxu0 %v2054_v60 }
0x1543   :  { %v1542_v63 = vrot.slane %v1514_v58, %v3037_v7  ;;  %2578 = vmatpush3.msra.mxu0 %v2054_v60 }
0x1545   :  { %1370 = vrot.lane.b32.xlu1 %v1349_v62, %s2754_s12  ;;  %v1136_v62 = vrot.slane %v1108_v23, %v3044_v15  ;;  %v1546_v21 = vcombine.high %v1542_v63, %v1542_v63 }
0x1547   :  { %v1578_v24 = vrot.slane %v1546_v21, %v3044_v15 }
0x1549   :  { %1804 = vrot.lane.b32.xlu1 %v1783_v61, %s2754_s12  ;;  %v1570_v61 = vrot.slane %v1542_v63, %v3044_v15 }
0x154d   :  { %503 = vrot.lane.b32.xlu1 %v484_v4, %s2754_s12  ;;  %v706_v4 = vrot.slane %v676_v2, %v3044_v15 }
0x1551   :  { %938 = vrot.lane.b32.xlu1 %v919_v8, %s2754_s12  ;;  %v1140_v8 = vrot.slane %v1110_v5, %v3044_v15 }
0x1555   :  { %1372 = vrot.lane.b32.xlu1 %v1353_v13, %s2754_s12  ;;  %v1574_v13 = vrot.slane %v1544_v9, %v3044_v15 }
0x1559   :  { %1806 = vrot.lane.b32.xlu1 %v1787_v29, %s2754_s12 }
0x155d   :  { %505 = vrot.lane.b32.xlu1 %v488_v18, %s2754_s12  ;;  %v1112_v18 = vcombine.high %v1108_v23, %v1108_v23 }
0x1561   :  { %940 = vrot.lane.b32.xlu1 %v923_v20, %s2754_s12  ;;  %v1144_v20 = vrot.slane %v1112_v18, %v3044_v15 }
0x1565   :  { %1374 = vrot.lane.b32.xlu1 %v1357_v22, %s2754_s12 }
0x1569   :  { %1808 = vrot.lane.b32.xlu1 %v1791_v25, %s2754_s12 }
0x156b   :  { %v1922_v26 = vpop.permute.xlu1 %1921 }
0x156c   :  { %v1924_v33 = vadd.f32 %v1922_v26, %v1914_v32 }
0x156d   :  { %507 = vrot.lane.b32.xlu1 %v492_v31, %s2754_s12 }
0x156e   :  { %2668 = vtanh.f32 %v1924_v33 }
0x156f   :  { %v494_v12 = vpop.permute.xlu1 %493 }
0x1570   :  { %518 = vst.msk [vmem:[#allocation2] sm:$0x1] %vm517_vm10, %v494_v12 }
0x1571   :  { %942 = vrot.lane.b32.xlu1 %v927_v35, %s2754_s12 }
0x1573   :  { %v929_v27 = vpop.permute.xlu1 %928 }
0x1574   :  { %952 = vst.msk [vmem:[#allocation2 + $0x2] sm:$0x1] %vm517_vm10, %v929_v27 }
0x1575   :  { %1376 = vrot.lane.b32.xlu1 %v1361_v37, %s2754_s12 }
0x1577   :  { %v1363_v38 = vpop.permute.xlu1 %1362 }
0x1578   :  { %1386 = vst.msk [vmem:[#allocation2 + $0x4] sm:$0x1] %vm517_vm10, %v1363_v38 }
0x1579   :  { %1810 = vrot.lane.b32.xlu1 %v1795_v40, %s2754_s12 }
0x157b   :  { %v2669_v44 = vpop.eup %2668  ;;  %v1797_v45 = vpop.permute.xlu1 %1796 }
0x157c   :  { %1820 = vst.msk [vmem:[#allocation2 + $0x6] sm:$0x1] %vm517_vm10, %v1797_v45  ;;  %1927 = vrot.lane.b32.xlu0 %v2669_v44, %s2753_s4 }
0x157f   :  { %v496_v49 = vpop.permute.xlu1 %495 }
0x1580   :  { %519 = vst.msk [vmem:[#allocation2 + $0x8] sm:$0x1] %vm517_vm10, %v496_v49  ;;  %719 = vrot.lane.b32.xlu0 %v698_v46, %s2754_s12  ;;  %v2053_v46 = vld [vmem:[%s3414_s6] sm:$0xff] }
0x1581   :  { %2579 = vmatprep.subr.mxu0 %v2053_v46 }
0x1582   :  { %2580 = vmatpush3.msra.mxu0 %v2053_v46 }
0x1583   :  { %v931_v51 = vpop.permute.xlu1 %930 }
0x1584   :  { %953 = vst.msk [vmem:[#allocation2 + $0xa] sm:$0x1] %vm517_vm10, %v931_v51  ;;  %1153 = vrot.lane.b32.xlu0 %v1132_v42, %s2754_s12 }
0x1587   :  { %v1365_v54 = vpop.permute.xlu1 %1364 }
0x1588   :  { %1387 = vst.msk [vmem:[#allocation2 + $0xc] sm:$0x1] %vm517_vm10, %v1365_v54  ;;  %1587 = vrot.lane.b32.xlu0 %v1566_v52, %s2754_s12 }
0x158b   :  { %v1799_v59 = vpop.permute.xlu1 %1798 }
0x158c   :  { %1821 = vst.msk [vmem:[#allocation2 + $0xe] sm:$0x1] %vm517_vm10, %v1799_v59  ;;  %721 = vrot.lane.b32.xlu0 %v702_v56, %s2754_s12 }
0x158f   :  { %v498_v1 = vpop.permute.xlu1 %497 }
0x1590   :  { %520 = vst.msk [vmem:[#allocation2 + $0x10] sm:$0x1] %vm517_vm10, %v498_v1  ;;  %1155 = vrot.lane.b32.xlu0 %v1136_v62, %s2754_s12 }
0x1593   :  { %v933_v3 = vpop.permute.xlu1 %932 }
0x1594   :  { %954 = vst.msk [vmem:[#allocation2 + $0x12] sm:$0x1] %vm517_vm10, %v933_v3  ;;  %1589 = vrot.lane.b32.xlu0 %v1570_v61, %s2754_s12 }
0x1597   :  { %v1367_v6 = vpop.permute.xlu1 %1366 }
0x1598   :  { %1388 = vst.msk [vmem:[#allocation2 + $0x14] sm:$0x1] %vm517_vm10, %v1367_v6  ;;  %723 = vrot.lane.b32.xlu0 %v706_v4, %s2754_s12 }
0x159b   :  { %v1801_v10 = vpop.permute.xlu1 %1800 }
0x159c   :  { %1822 = vst.msk [vmem:[#allocation2 + $0x16] sm:$0x1] %vm517_vm10, %v1801_v10  ;;  %1157 = vrot.lane.b32.xlu0 %v1140_v8, %s2754_s12 }
0x159f   :  { %v500_v29 = vpop.permute.xlu1 %499 }
0x15a0   :  { %521 = vst.msk [vmem:[#allocation2 + $0x18] sm:$0x1] %vm517_vm10, %v500_v29  ;;  %1591 = vrot.lane.b32.xlu0 %v1574_v13, %s2754_s12 }
0x15a3   :  { %v935_v19 = vpop.permute.xlu1 %934 }
0x15a4   :  { %955 = vst.msk [vmem:[#allocation2 + $0x1a] sm:$0x1] %vm517_vm10, %v935_v19  ;;  %725 = vrot.lane.b32.xlu0 %v710_v17, %s2754_s12 }
0x15a7   :  { %v1369_v22 = vpop.permute.xlu1 %1368 }
0x15a8   :  { %1389 = vst.msk [vmem:[#allocation2 + $0x1c] sm:$0x1] %vm517_vm10, %v1369_v22  ;;  %1159 = vrot.lane.b32.xlu0 %v1144_v20, %s2754_s12 }
0x15ab   :  { %v1803_v25 = vpop.permute.xlu1 %1802 }
0x15ac   :  { %1823 = vst.msk [vmem:[#allocation2 + $0x1e] sm:$0x1] %vm517_vm10, %v1803_v25  ;;  %1593 = vrot.lane.b32.xlu0 %v1578_v24, %s2754_s12 }
0x15af   :  { %v502_v30 = vpop.permute.xlu1 %501 }
0x15b0   :  { %522 = vst.msk [vmem:[#allocation2 + $0x20] sm:$0x1] %vm517_vm10, %v502_v30 }
0x15b3   :  { %v937_v32 = vpop.permute.xlu1 %936 }
0x15b4   :  { %956 = vst.msk [vmem:[#allocation2 + $0x22] sm:$0x1] %vm517_vm10, %v937_v32 }
0x15b7   :  { %v1371_v26 = vpop.permute.xlu1 %1370 }
0x15b8   :  { %1390 = vst.msk [vmem:[#allocation2 + $0x24] sm:$0x1] %vm517_vm10, %v1371_v26 }
0x15bb   :  { %v1805_v31 = vpop.permute.xlu1 %1804 }
0x15bc   :  { %1824 = vst.msk [vmem:[#allocation2 + $0x26] sm:$0x1] %vm517_vm10, %v1805_v31 }
0x15bf   :  { %v504_v11 = vpop.permute.xlu1 %503 }
0x15c0   :  { %523 = vst.msk [vmem:[#allocation2 + $0x28] sm:$0x1] %vm517_vm10, %v504_v11 }
0x15c3   :  { %v939_v33 = vpop.permute.xlu1 %938 }
0x15c4   :  { %957 = vst.msk [vmem:[#allocation2 + $0x2a] sm:$0x1] %vm517_vm10, %v939_v33 }
0x15c7   :  { %v1373_v34 = vpop.permute.xlu1 %1372 }
0x15c8   :  { %1391 = vst.msk [vmem:[#allocation2 + $0x2c] sm:$0x1] %vm517_vm10, %v1373_v34 }
0x15cb   :  { %v1807_v12 = vpop.permute.xlu1 %1806 }
0x15cc   :  { %1825 = vst.msk [vmem:[#allocation2 + $0x2e] sm:$0x1] %vm517_vm10, %v1807_v12  ;;  %v2340_v12 = vld [vmem:[%s3415_s7] ss:$0 sm:$0xff]  ;;  %s2756_s7 = smov [#allocation6]  }
0x15cd   :  { %s2294_s10 = sshll.u32 %s2756_s7, 4  ;;  %s2295_s10 = int_to_ptr.vmem [resolvable:$true] %s2294_s10 }
0x15ce   :  { %s2722_s5 = scalar_lea.vmem %s2295_s10, 1024  ;;  %p2727_p6 = scmp.lt.s32.totalorder %s2295_s10, %s2295_s10 }
0x15cf   :  { %v506_v35 = vpop.permute.xlu1 %505  ;;  %p2723_p5 = scmp.ne.s32.totalorder %s2295_s10, %s2722_s5  ;;  %p2728_p7 = scmp.lt.s32.totalorder %s2722_s5, %s2722_s5 }
0x15d0   :  { %524 = vst.msk [vmem:[#allocation2 + $0x30] sm:$0x1] %vm517_vm10, %v506_v35 }
0x15d1   :  { %p2729_p8 = por %p2728_p7, %p2727_p6 }
0x15d3   :  { %v941_v36 = vpop.permute.xlu1 %940  ;;  %p2730_p9 = pnand %p2729_p8, %p2723_p5 }
0x15d4   :  { %958 = vst.msk [vmem:[#allocation2 + $0x32] sm:$0x1] %vm517_vm10, %v941_v36 }
0x15d7   :  { %v1375_v57 = vpop.permute.xlu1 %1374 }
0x15d8   :  { %1392 = vst.msk [vmem:[#allocation2 + $0x34] sm:$0x1] %vm517_vm10, %v1375_v57 }
0x15db   :  { %v1809_v27 = vpop.permute.xlu1 %1808 }
0x15dc   :  { %1826 = vst.msk [vmem:[#allocation2 + $0x36] sm:$0x1] %vm517_vm10, %v1809_v27 }
0x15df   :  { %v508_v37 = vpop.permute.xlu1 %507 }
0x15e0   :  { %525 = vst.msk [vmem:[#allocation2 + $0x38] sm:$0x1] %vm517_vm10, %v508_v37 }
0x15e3   :  { %v943_v0 = vpop.permute.xlu1 %942 }
0x15e4   :  { %959 = vst.msk [vmem:[#allocation2 + $0x3a] sm:$0x1] %vm517_vm10, %v943_v0 }
0x15e7   :  { %v1377_v28 = vpop.permute.xlu1 %1376 }
0x15e8   :  { %1393 = vst.msk [vmem:[#allocation2 + $0x3c] sm:$0x1] %vm517_vm10, %v1377_v28 }
0x15eb   :  { %v1811_v38 = vpop.permute.xlu1 %1810 }
0x15ec   :  { %1827 = vst.msk [vmem:[#allocation2 + $0x3e] sm:$0x1] %vm517_vm10, %v1811_v38 }
0x15ee   :  { %v1928_v40 = vpop.permute.xlu0 %1927 }
0x15ef   :  { %v1930_v43 = vmul.f32 %v3080_v47, %v1928_v40 }
0x15f1   :  { %v1939_v44 = vrot.slane %v1930_v43, %v3037_v7  ;;  %v1932_v47 = vcombine.high %v1930_v43, %v1930_v43 }
0x15f2   :  { %v720_v45 = vpop.permute.xlu0 %719 }
0x15f3   :  { %v1947_v48 = vcombine.high %v1939_v44, %v1939_v44  ;;  %v1955_v49 = vrot.slane %v1939_v44, %v3037_v7  ;;  %739 = vst.msk [vmem:[#allocation2 + $0x21] sm:$0x1] %vm517_vm10, %v720_v45  ;;  %v1946_v51 = vrot.slane %v1932_v47, %v3037_v7 }
0x15f5   :  { %v1984_v42 = vrot.slane %v1955_v49, %v3044_v15  ;;  %v1969_v50 = vrot.slane %v1947_v48, %v3037_v7  ;;  %v1977_v39 = vcombine.high %v1955_v49, %v1955_v49  ;;  %v1962_v56 = vrot.slane %v1946_v51, %v3037_v7 }
0x15f6   :  { %v1154_v55 = vpop.permute.xlu0 %1153  ;;  %v1948_v58 = vcombine.high %v1946_v51, %v1946_v51 }
0x15f7   :  { %1173 = vst.msk [vmem:[#allocation2 + $0x23] sm:$0x1] %vm517_vm10, %v1154_v55  ;;  %2013 = vrot.lane.b32.xlu0 %v1984_v42, %s2754_s12  ;;  %v1988_v52 = vrot.slane %v1969_v50, %v3044_v15  ;;  %v1992_v54 = vrot.slane %v1977_v39, %v3044_v15  ;;  %v2000_v59 = vrot.slane %v1962_v56, %v3044_v15 }
0x15f8   :  { %v1979_v62 = vcombine.high %v1969_v50, %v1969_v50  ;;  %v1976_v1 = vrot.slane %v1948_v58, %v3037_v7  ;;  %v1978_v3 = vcombine.high %v1962_v56, %v1962_v56 }
0x15fa   :  { %v1588_v53 = vpop.permute.xlu0 %1587  ;;  %v1996_v61 = vrot.slane %v1979_v62, %v3044_v15  ;;  %v2004_v4 = vrot.slane %v1976_v1, %v3044_v15  ;;  %v2008_v6 = vrot.slane %v1978_v3, %v3044_v15  ;;  %v1980_v8 = vcombine.high %v1976_v1, %v1976_v1 }
0x15fb   :  { %1607 = vst.msk [vmem:[#allocation2 + $0x25] sm:$0x1] %vm517_vm10, %v1588_v53  ;;  %2015 = vrot.lane.b32.xlu0 %v1988_v52, %s2754_s12 }
0x15fc   :  { %v2012_v7 = vrot.slane %v1980_v8, %v3044_v15 }
0x15fe   :  { %v722_v23 = vpop.permute.xlu0 %721 }
0x15ff   :  { %740 = vst.msk [vmem:[#allocation2 + $0x29] sm:$0x1] %vm517_vm10, %v722_v23  ;;  %2017 = vrot.lane.b32.xlu0 %v1992_v54, %s2754_s12 }
0x1602   :  { %v1156_v63 = vpop.permute.xlu0 %1155 }
0x1603   :  { %1174 = vst.msk [vmem:[#allocation2 + $0x2b] sm:$0x1] %vm517_vm10, %v1156_v63  ;;  %2021 = vrot.lane.b32.xlu0 %v2000_v59, %s2754_s12 }
0x1606   :  { %v1590_v2 = vpop.permute.xlu0 %1589 }
0x1607   :  { %1608 = vst.msk [vmem:[#allocation2 + $0x2d] sm:$0x1] %vm517_vm10, %v1590_v2  ;;  %2019 = vrot.lane.b32.xlu0 %v1996_v61, %s2754_s12 }
0x160a   :  { %v724_v5 = vpop.permute.xlu0 %723 }
0x160b   :  { %741 = vst.msk [vmem:[#allocation2 + $0x31] sm:$0x1] %vm517_vm10, %v724_v5  ;;  %2023 = vrot.lane.b32.xlu0 %v2004_v4, %s2754_s12 }
0x160e   :  { %v1158_v9 = vpop.permute.xlu0 %1157 }
0x160f   :  { %1175 = vst.msk [vmem:[#allocation2 + $0x33] sm:$0x1] %vm517_vm10, %v1158_v9  ;;  %2025 = vrot.lane.b32.xlu0 %v2008_v6, %s2754_s12 }
0x1612   :  { %v1592_v10 = vpop.permute.xlu0 %1591 }
0x1613   :  { %1609 = vst.msk [vmem:[#allocation2 + $0x35] sm:$0x1] %vm517_vm10, %v1592_v10  ;;  %2027 = vrot.lane.b32.xlu0 %v2012_v7, %s2754_s12 }
0x1616   :  { %v726_v13 = vpop.permute.xlu0 %725 }
0x1617   :  { %742 = vst.msk [vmem:[#allocation2 + $0x39] sm:$0x1] %vm517_vm10, %v726_v13 }
0x161a   :  { %v1160_v16 = vpop.permute.xlu0 %1159 }
0x161b   :  { %1176 = vst.msk [vmem:[#allocation2 + $0x3b] sm:$0x1] %vm517_vm10, %v1160_v16 }
0x161e   :  { %v1594_v29 = vpop.permute.xlu0 %1593 }
0x161f   :  { %1610 = vst.msk [vmem:[#allocation2 + $0x3d] sm:$0x1] %vm517_vm10, %v1594_v29 }
0x1669   :  { %v2014_v17 = vpop.permute.xlu0 %2013 }
0x166a   :  { %2037 = vst.msk [vmem:[#allocation2 + $0x7] sm:$0x1] %vm517_vm10, %v2014_v17 }
0x166d   :  { %v2016_v18 = vpop.permute.xlu0 %2015 }
0x166e   :  { %2038 = vst.msk [vmem:[#allocation2 + $0xf] sm:$0x1] %vm517_vm10, %v2016_v18 }
0x1671   :  { %v2018_v15 = vpop.permute.xlu0 %2017  ;;  %v2045_v19 = vld [vmem:[#allocation2] sm:$0xff] }
0x1672   :  { %2039 = vst.msk [vmem:[#allocation2 + $0x17] sm:$0x1] %vm517_vm10, %v2018_v15  ;;  %2581 = vmatprep.mubr.msk.f32.mxu0 %vm56_vm1, %v2045_v19 }
0x1675   :  { %v2022_v20 = vpop.permute.xlu0 %2021  ;;  %v2046_v21 = vld [vmem:[#allocation2 + $0x8] sm:$0xff] }
0x1676   :  { %2041 = vst.msk [vmem:[#allocation2 + $0x27] sm:$0x1] %vm517_vm10, %v2022_v20  ;;  %2582 = vmatmul.mubr.msk.f32.vlgmr.msra.gmra.mxu0 %vm56_vm1, %v2046_v21 }
0x1679   :  { %v2020_v22 = vpop.permute.xlu0 %2019  ;;  %v2047_v24 = vld [vmem:[#allocation2 + $0x10] sm:$0xff] }
0x167a   :  { %2040 = vst.msk [vmem:[#allocation2 + $0x1f] sm:$0x1] %vm517_vm10, %v2020_v22  ;;  %2584 = vmatprep.mubr.msk.f32.mxu0 %vm56_vm1, %v2047_v24 }
0x167d   :  { %v2024_v25 = vpop.permute.xlu0 %2023  ;;  %v2049_v26 = vld [vmem:[#allocation2 + $0x20] sm:$0xff] }
0x167e   :  { %2042 = vst.msk [vmem:[#allocation2 + $0x2f] sm:$0x1] %vm517_vm10, %v2024_v25 }
0x1681   :  { %v2026_v30 = vpop.permute.xlu0 %2025  ;;  %v2048_v32 = vld [vmem:[#allocation2 + $0x18] sm:$0xff] }
0x1682   :  { %2043 = vst.msk [vmem:[#allocation2 + $0x37] sm:$0x1] %vm517_vm10, %v2026_v30  ;;  %2585 = vmatmul.mubr.msk.f32.gmra.mxu0 %vm56_vm1, %v2048_v32 }
0x1683   :  { %2587 = vmatprep.mubr.msk.f32.mxu0 %vm56_vm1, %v2049_v26 }
0x1685   :  { %v2028_v31 = vpop.permute.xlu0 %2027  ;;  %v2050_v11 = vld [vmem:[#allocation2 + $0x28] sm:$0xff] }
0x1686   :  { %2044 = vst.msk [vmem:[#allocation2 + $0x3f] sm:$0x1] %vm517_vm10, %v2028_v31  ;;  %2588 = vmatmul.mubr.msk.f32.gmra.mxu0 %vm56_vm1, %v2050_v11 }
0x1689   :  { %v2051_v33 = vld [vmem:[#allocation2 + $0x30] sm:$0xff] }
0x168a   :  { %2590 = vmatprep.mubr.msk.f32.mxu0 %vm56_vm1, %v2051_v33 }
0x168d   :  { %v2052_v34 = vld [vmem:[#allocation2 + $0x38] sm:$0xff] }
0x168e   :  { %2591 = vmatmul.mubr.msk.f32.gmra.mxu0 %vm56_vm1, %v2052_v34 }
0x1736   :  { %v2583_v35 = vpop.f32.mrf.mxu0 }
0x1737   :  { %v3334_v36 = vadd.f32 %v2583_v35, %v2340_v12 }
0x1738   :  { %v2154_v57 = vpop.f32.mrf.mxu0 }
0x1739   :  { %v3336_v27 = vadd.f32 %v2340_v12, %v2154_v57  ;;  %2195 = vmax.xlane.f32.xlu0 %v3334_v36 }
0x173b   :  { %2193 = vmax.xlane.f32.xlu1 %v3336_v27 }
0x1742   :  { %v2586_v37 = vpop.f32.mrf.mxu0 }
0x1743   :  { %v3340_v0 = vadd.f32 %v2586_v37, %v2340_v12 }
0x1744   :  { %v2164_v28 = vpop.f32.mrf.mxu0 }
0x1745   :  { %v3342_v38 = vadd.f32 %v2340_v12, %v2164_v28  ;;  %2199 = vmax.xlane.f32.xlu1 %v3340_v0 }
0x1746   :  { %v2589_v40 = vpop.f32.mrf.mxu0 }
0x1747   :  { %v3345_v14 = vadd.f32 %v2589_v40, %v2340_v12  ;;  %2197 = vmax.xlane.f32.xlu0 %v3342_v38 }
0x1748   :  { %v2174_v41 = vpop.f32.mrf.mxu0 }
0x1749   :  { %v3348_v43 = vadd.f32 %v2340_v12, %v2174_v41  ;;  %2203 = vmax.xlane.f32.xlu1 %v3345_v14 }
0x174b   :  { %2201 = vmax.xlane.f32.xlu0 %v3348_v43 }
0x174e   :  { %v2592_v44 = vpop.f32.mrf.mxu0 }
0x174f   :  { %v3352_v45 = vadd.f32 %v2592_v44, %v2340_v12 }
0x1750   :  { %v2184_v60 = vpop.f32.mrf.mxu0 }
0x1751   :  { %v3354_v46 = vadd.f32 %v2340_v12, %v2184_v60  ;;  %2207 = vmax.xlane.f32.xlu1 %v3352_v45 }
0x1753   :  { %2205 = vmax.xlane.f32.xlu0 %v3354_v46 }
0x17c2   :  { %v2196_v48 = vpop.xlane.xlu0 %2195 }
0x17c3   :  { %v2210_v49 = vsub.f32 %v3334_v36, %v2196_v48 }
0x17c4   :  { %v3359_v47 = vpop.xlane.xlu1 %2193 }
0x17c5   :  { %v2219_v42 = vmul.f32 1.442695, %v2210_v49  ;;  %v2209_v50 = vsub.f32 %v3336_v27, %v3359_v47 }
0x17c7   :  { %2670 = vpow2.f32 %v2219_v42  ;;  %v2217_v55 = vmul.f32 1.442695, %v2209_v50 }
0x17c9   :  { %2672 = vpow2.f32 %v2217_v55 }
0x17ce   :  { %v3363_v51 = vpop.xlane.xlu1 %2199 }
0x17cf   :  { %v2212_v52 = vsub.f32 %v3340_v0, %v3363_v51 }
0x17d0   :  { %v3367_v39 = vpop.xlane.xlu0 %2197 }
0x17d1   :  { %v2223_v53 = vmul.f32 1.442695, %v2212_v52  ;;  %v2211_v54 = vsub.f32 %v3342_v38, %v3367_v39 }
0x17d2   :  { %v3371_v56 = vpop.xlane.xlu1 %2203 }
0x17d3   :  { %2674 = vpow2.f32 %v2223_v53  ;;  %v2221_v23 = vmul.f32 1.442695, %v2211_v54  ;;  %v2214_v58 = vsub.f32 %v3345_v14, %v3371_v56 }
0x17d4   :  { %v2671_v59 = vpop.eup %2670  ;;  %v3375_v62 = vpop.xlane.xlu0 %2201 }
0x17d5   :  { %2676 = vpow2.f32 %v2221_v23  ;;  %v2227_v63 = vmul.f32 1.442695, %v2214_v58  ;;  %v2213_v1 = vsub.f32 %v3348_v43, %v3375_v62  ;;  %2235 = vadd.xlane.f32.xlu1 %v2671_v59 }
0x17d6   :  { %v2673_v61 = vpop.eup %2672 }
0x17d7   :  { %2678 = vpow2.f32 %v2227_v63  ;;  %v2225_v2 = vmul.f32 1.442695, %v2213_v1  ;;  %2233 = vadd.xlane.f32.xlu0 %v2673_v61 }
0x17d9   :  { %2680 = vpow2.f32 %v2225_v2 }
0x17da   :  { %v3379_v3 = vpop.xlane.xlu1 %2207 }
0x17db   :  { %v2216_v4 = vsub.f32 %v3352_v45, %v3379_v3 }
0x17dc   :  { %v3383_v5 = vpop.xlane.xlu0 %2205 }
0x17dd   :  { %v2231_v6 = vmul.f32 1.442695, %v2216_v4  ;;  %v2215_v8 = vsub.f32 %v3354_v46, %v3383_v5 }
0x17df   :  { %2682 = vpow2.f32 %v2231_v6  ;;  %v2229_v9 = vmul.f32 1.442695, %v2215_v8 }
0x17e0   :  { %v2675_v7 = vpop.eup %2674 }
0x17e1   :  { %2684 = vpow2.f32 %v2229_v9  ;;  %2239 = vadd.xlane.f32.xlu1 %v2675_v7 }
0x17e2   :  { %v2677_v10 = vpop.eup %2676 }
0x17e3   :  { %2237 = vadd.xlane.f32.xlu0 %v2677_v10 }
0x17e4   :  { %v2679_v13 = vpop.eup %2678 }
0x17e5   :  { %2243 = vadd.xlane.f32.xlu1 %v2679_v13 }
0x17e6   :  { %v2681_v16 = vpop.eup %2680 }
0x17e7   :  { %2241 = vadd.xlane.f32.xlu0 %v2681_v16 }
0x17ec   :  { %v2683_v29 = vpop.eup %2682 }
0x17ed   :  { %2247 = vadd.xlane.f32.xlu1 %v2683_v29 }
0x17ee   :  { %v2685_v17 = vpop.eup %2684 }
0x17ef   :  { %2245 = vadd.xlane.f32.xlu0 %v2685_v17 }
0x185e   :  { %v2236_v18 = vpop.xlane.xlu1 %2235 }
0x185f   :  { %2686 = vlog2.f32 %v2236_v18 }
0x1860   :  { %v2234_v15 = vpop.xlane.xlu0 %2233 }
0x1861   :  { %2688 = vlog2.f32 %v2234_v15 }
0x186a   :  { %v2240_v19 = vpop.xlane.xlu1 %2239 }
0x186b   :  { %2690 = vlog2.f32 %v2240_v19 }
0x186c   :  { %v2687_v20 = vpop.eup %2686  ;;  %v2238_v21 = vpop.xlane.xlu0 %2237 }
0x186d   :  { %v2252_v22 = vmul.f32 0.6931472, %v2687_v20  ;;  %2692 = vlog2.f32 %v2238_v21 }
0x186e   :  { %v2689_v24 = vpop.eup %2688  ;;  %v2244_v25 = vpop.xlane.xlu1 %2243 }
0x186f   :  { %v2266_v30 = vadd.f32 %v2252_v22, %v2196_v48  ;;  %v2250_v32 = vmul.f32 0.6931472, %v2689_v24  ;;  %2694 = vlog2.f32 %v2244_v25 }
0x1870   :  { %v2242_v26 = vpop.xlane.xlu0 %2241 }
0x1871   :  { %v2274_v31 = vsub.f32 %v3334_v36, %v2266_v30  ;;  %v2265_v11 = vadd.f32 %v2250_v32, %v3359_v47  ;;  %2696 = vlog2.f32 %v2242_v26 }
0x1873   :  { %2282 = vst [vmem:[#allocation6 + $0x8] sm:$0xff] %v2274_v31  ;;  %v2273_v33 = vsub.f32 %v3336_v27, %v2265_v11 }
0x1875   :  { %2281 = vst [vmem:[#allocation6] sm:$0xff] %v2273_v33 }
0x1876   :  { %v2248_v34 = vpop.xlane.xlu1 %2247 }
0x1877   :  { %2698 = vlog2.f32 %v2248_v34 }
0x1878   :  { %v2691_v12 = vpop.eup %2690  ;;  %v2246_v35 = vpop.xlane.xlu0 %2245 }
0x1879   :  { %v2256_v57 = vmul.f32 0.6931472, %v2691_v12  ;;  %2700 = vlog2.f32 %v2246_v35 }
0x187a   :  { %v2693_v37 = vpop.eup %2692 }
0x187b   :  { %v2268_v28 = vadd.f32 %v2256_v57, %v3363_v51  ;;  %v2254_v40 = vmul.f32 0.6931472, %v2693_v37 }
0x187c   :  { %v2695_v41 = vpop.eup %2694 }
0x187d   :  { %v2276_v36 = vsub.f32 %v3340_v0, %v2268_v28  ;;  %v2267_v44 = vadd.f32 %v2254_v40, %v3367_v39  ;;  %v2260_v60 = vmul.f32 0.6931472, %v2695_v41 }
0x187e   :  { %v2697_v48 = vpop.eup %2696 }
0x187f   :  { %2284 = vst [vmem:[#allocation6 + $0x18] sm:$0xff] %v2276_v36  ;;  %v2275_v27 = vsub.f32 %v3342_v38, %v2267_v44  ;;  %v2270_v49 = vadd.f32 %v2260_v60, %v3371_v56  ;;  %v2258_v47 = vmul.f32 0.6931472, %v2697_v48 }
0x1881   :  { %2283 = vst [vmem:[#allocation6 + $0x10] sm:$0xff] %v2275_v27  ;;  %v2278_v42 = vsub.f32 %v3345_v14, %v2270_v49  ;;  %v2269_v50 = vadd.f32 %v2258_v47, %v3375_v62 }
0x1883   :  { %2286 = vst [vmem:[#allocation6 + $0x28] sm:$0xff] %v2278_v42  ;;  %v2277_v55 = vsub.f32 %v3348_v43, %v2269_v50 }
0x1884   :  { %v2699_v51 = vpop.eup %2698 }
0x1885   :  { %2285 = vst [vmem:[#allocation6 + $0x20] sm:$0xff] %v2277_v55  ;;  %v2264_v0 = vmul.f32 0.6931472, %v2699_v51 }
0x1886   :  { %v2701_v52 = vpop.eup %2700 }
0x1887   :  { %v2272_v39 = vadd.f32 %v2264_v0, %v3379_v3  ;;  %v2262_v53 = vmul.f32 0.6931472, %v2701_v52 }
0x1889   :  { %v2280_v38 = vsub.f32 %v3352_v45, %v2272_v39  ;;  %v2271_v54 = vadd.f32 %v2262_v53, %v3383_v5 }
0x188b   :  { %2288 = vst [vmem:[#allocation6 + $0x38] sm:$0xff] %v2280_v38  ;;  %v2279_v14 = vsub.f32 %v3354_v46, %v2271_v54 }
0x188d   :  { %2287 = vst [vmem:[#allocation6 + $0x30] sm:$0xff] %v2279_v14 }
0x188e   :  { %2733 = shalt.err (!%p2730_p9)
}
0x188f   :  { %2300 = dma.vmem_to_hbm [thread:$0]  %s2295_s10, 1024, %s3416_s8, [#allocation5], %s2747_s30, %s2747_s30, %s2748_s9  }
0x1890   :  { %2744 = dma.done.wait [#allocation5], 1024  }
0x1891   :  { %2745 = vsyncadd [#allocation5], 4294966272 }
0x1892   :  { %2304 = vsyncpa [#allocation4], 1 }
0x1893   :  { %2305 = vsyncpa [#allocation5], 1 }

</bundles_post_ra>
